<compile_context>
chip_gen: v7x
topology: tpu7x:2x2x1
jax: 0.10.0
libtpu: 0.0.40
codegen_flags: <defaults>
</compile_context>

<pallas_src>
import math
import functools

import jax
import jax.numpy as jnp
from jax.experimental import pallas as pl
from jax.experimental.pallas import tpu as pltpu


# ----------------------------- kernel --------------------------------------

def decoder_layer_kernel(
    enc_ref, smask_ref, tgt_ref, tmask_ref,
    wq1, bq1, wk1, bk1, wv1, bv1, wo1, bo1,          # self-attention (fused heads)
    wq2, bq2, wk2, bk2, wv2, bv2, wo2, bo2,          # enc-dec attention (fused heads)
    w1, b1, w2, b2,                                  # feed-forward
    gamma, beta,                                     # layer norm (shared)
    out_ref,
    *, n_heads, d_k,
):
    Bb, S_t, d_model = tgt_ref.shape
    _, S_e, _ = enc_ref.shape

    # Batch folded into the row (sublane) axis for all dense matmuls / norms.
    x = tgt_ref[...].astype(jnp.float32).reshape(Bb * S_t, d_model)
    enc = enc_ref[...].astype(jnp.float32).reshape(Bb * S_e, d_model)
    tmask = tmask_ref[...]            # additive mask, (Bb, S_t, S_t)
    smask = smask_ref[...]            # additive mask, (Bb, S_t, S_e)

    # Hoisted layer-norm params: one VMEM read / broadcast, reused 3x.
    g = gamma[...]                    # (1, d_model)
    b = beta[...]                     # (1, d_model)

    eps = jnp.float32(1e-5)
    scale = jnp.float32(1.0 / math.sqrt(d_k))

    def layer_norm(v):                # v: (rows, d_model)
        mu = jnp.mean(v, axis=-1, keepdims=True)
        var = jnp.mean((v - mu) * (v - mu), axis=-1, keepdims=True)
        return (v - mu) * jax.lax.rsqrt(var + eps) * g + b

    def mha(q_rows, kv_rows, S_q, S_kv, add_mask,
            wq, bq, wk, bk, wv, bv, wo, bo):
        # Fused projections: one wide MXU matmul each for Q / K / V (all heads).
        q = (jnp.dot(q_rows, wq[...], preferred_element_type=jnp.float32)
             + bq[...]).reshape(Bb, S_q, n_heads * d_k)
        k = (jnp.dot(kv_rows, wk[...], preferred_element_type=jnp.float32)
             + bk[...]).reshape(Bb, S_kv, n_heads * d_k)
        v = (jnp.dot(kv_rows, wv[...], preferred_element_type=jnp.float32)
             + bv[...]).reshape(Bb, S_kv, n_heads * d_k)

        heads = []
        for h in range(n_heads):      # static unroll; batched over Bb via einsum
            sl = slice(h * d_k, (h + 1) * d_k)
            qh, kh, vh = q[:, :, sl], k[:, :, sl], v[:, :, sl]
            s = jnp.einsum('bqd,bkd->bqk', qh, kh,
                           preferred_element_type=jnp.float32) * scale + add_mask
            s = s - jnp.max(s, axis=-1, keepdims=True)
            e = jnp.exp(s)
            p = e * pl.reciprocal(jnp.sum(e, axis=-1, keepdims=True), approx=True)
            heads.append(jnp.einsum('bqk,bkd->bqd', p, vh,
                                    preferred_element_type=jnp.float32))

        heads = jnp.concatenate(heads, axis=-1).reshape(Bb * S_q, n_heads * d_k)
        # Single fused output projection (was n_heads tiny dots + accumulate).
        return jnp.dot(heads, wo[...], preferred_element_type=jnp.float32) + bo[...]

    # 1) masked self-attention + residual + norm
    x = layer_norm(x + mha(x, x, S_t, S_t, tmask,
                           wq1, bq1, wk1, bk1, wv1, bv1, wo1, bo1))
    # 2) encoder-decoder attention + residual + norm
    x = layer_norm(x + mha(x, enc, S_t, S_e, smask,
                           wq2, bq2, wk2, bk2, wv2, bv2, wo2, bo2))
    # 3) point-wise feed-forward + residual + norm
    h1 = jnp.dot(x, w1[...], preferred_element_type=jnp.float32) + b1[...]
    ff = jnp.dot(jnp.maximum(h1, 0.0), w2[...],
                 preferred_element_type=jnp.float32) + b2[...]
    x = layer_norm(x + ff)

    # TODO(synk): output lane width is d_model=32 (<128) -> masked stores;
    #             acceptable here, moot once d_model >= 128 in real use.
    out_ref[...] = x.reshape(Bb, S_t, d_model).astype(out_ref.dtype)


# ----------------------------- wrapper --------------------------------------

def decoder_layer(encoding, src_mask, target, target_mask, params,
                  *, n_heads, d_k):
    B, S_t, d_model = target.shape
    _, S_e, _ = encoding.shape

    # --- fuse per-head projection weights (layout plumbing, wrapper-side) ---
    def fuse_qkv(w, bias):
        # (H, d_model, d_k) -> (d_model, H*d_k) ; (H, 1, d_k) -> (1, H*d_k)
        wf = jnp.transpose(w, (1, 0, 2)).reshape(d_model, n_heads * d_k)
        bf = bias.reshape(1, n_heads * d_k)
        return wf, bf

    wq1, bq1 = fuse_qkv(params["wq1"], params["bq1"])
    wk1, bk1 = fuse_qkv(params["wk1"], params["bk1"])
    wv1, bv1 = fuse_qkv(params["wv1"], params["bv1"])
    wo1 = params["wo1"].reshape(n_heads * d_k, d_model)
    bo1 = params["bo1"]
    wq2, bq2 = fuse_qkv(params["wq2"], params["bq2"])
    wk2, bk2 = fuse_qkv(params["wk2"], params["bk2"])
    wv2, bv2 = fuse_qkv(params["wv2"], params["bv2"])
    wo2 = params["wo2"].reshape(n_heads * d_k, d_model)
    bo2 = params["bo2"]

    # --- additive masks: hoist the compare+select out of the head loop -------
    neg = jnp.float32(-1000000000.0)
    tmask_add = jnp.where(target_mask == 0, neg, jnp.float32(0.0))
    smask_add = jnp.where(src_mask == 0, neg, jnp.float32(0.0))

    # --- grid choice: collapse on single-TC chips, keep parallel batch on v7x
    kind = jax.devices()[0].device_kind.lower()
    two_tc = ("v7" in kind) or ("7x" in kind)
    n_blocks = 2 if (two_tc and B >= 2 and B % 2 == 0) else 1
    Bb = B // n_blocks

    def batched(shape):
        nd = len(shape)
        return pl.BlockSpec((Bb,) + tuple(shape[1:]),
                            lambda g, nd=nd: (g,) + (0,) * (nd - 1))

    def full(arr):
        nd = arr.ndim
        return pl.BlockSpec(arr.shape, lambda g, nd=nd: (0,) * nd)

    weight_list = [
        wq1, bq1, wk1, bk1, wv1, bv1, wo1, bo1,
        wq2, bq2, wk2, bk2, wv2, bv2, wo2, bo2,
        params["w1"], params["b1"], params["w2"], params["b2"],
        params["gamma"], params["beta"],
    ]

    in_specs = [
        batched(encoding.shape), batched(smask_add.shape),
        batched(target.shape), batched(tmask_add.shape),
    ] + [full(w) for w in weight_list]

    kernel = functools.partial(decoder_layer_kernel, n_heads=n_heads, d_k=d_k)

    return pl.pallas_call(
        kernel,
        out_shape=jax.ShapeDtypeStruct((B, S_t, d_model), jnp.float32),
        grid=(n_blocks,),
        in_specs=in_specs,
        out_specs=pl.BlockSpec((Bb, S_t, d_model), lambda g: (g, 0, 0)),
        compiler_params=pltpu.CompilerParams(
            dimension_semantics=("parallel",)),
    )(encoding, smask_add, target, tmask_add, *weight_list)


# ----------------------------- reference (pure JAX) --------------------------

def decoder_layer_ref(encoding, src_mask, target, target_mask, params,
                      *, n_heads, d_k):
    def layer_norm(v):
        mu = jnp.mean(v, axis=-1, keepdims=True)
        var = jnp.mean((v - mu) ** 2, axis=-1, keepdims=True)
        return (v - mu) / jnp.sqrt(var + 1e-5) * params["gamma"] + params["beta"]

    def mha(q_in, kv_in, mask, wq, bq, wk, bk, wv, bv, wo, bo):
        out = 0.0
        for h in range(n_heads):
            qh = q_in @ wq[h] + bq[h]
            kh = kv_in @ wk[h] + bk[h]
            vh = kv_in @ wv[h] + bv[h]
            s = (qh @ jnp.swapaxes(kh, -1, -2)) / math.sqrt(d_k)
            s = jnp.where(mask == 0.0, -1e9, s)
            p = jax.nn.softmax(s, axis=-1)
            out = out + (p @ vh) @ wo[h]
        return out + bo

    x = layer_norm(target + mha(target, target, target_mask,
                                params["wq1"], params["bq1"], params["wk1"], params["bk1"],
                                params["wv1"], params["bv1"], params["wo1"], params["bo1"]))
    x = layer_norm(x + mha(x, encoding, src_mask,
                           params["wq2"], params["bq2"], params["wk2"], params["bk2"],
                           params["wv2"], params["bv2"], params["wo2"], params["bo2"]))
    h1 = x @ params["w1"] + params["b1"]
    ff = jnp.maximum(h1, 0.0) @ params["w2"] + params["b2"]
    return layer_norm(x + ff)


# ----------------------------- main ------------------------------------------

if __name__ == "__main__":
    B, S_t, S_e = 2, 8, 16
    n_heads, d_model, d_k, d_ff = 4, 32, 8, 64

    key = jax.random.PRNGKey(0)
    ks = iter(jax.random.split(key, 40))

    def init(shape, scale=0.1):
        return (scale * jax.random.normal(next(ks), shape)).astype(jnp.float32)

    params = {
        # self-attention (per-head projection weights, x @ W layout)
        "wq1": init((n_heads, d_model, d_k)), "bq1": init((n_heads, 1, d_k)),
        "wk1": init((n_heads, d_model, d_k)), "bk1": init((n_heads, 1, d_k)),
        "wv1": init((n_heads, d_model, d_k)), "bv1": init((n_heads, 1, d_k)),
        "wo1": init((n_heads, d_k, d_model)), "bo1": init((1, d_model)),
        # enc-dec attention
        "wq2": init((n_heads, d_model, d_k)), "bq2": init((n_heads, 1, d_k)),
        "wk2": init((n_heads, d_model, d_k)), "bk2": init((n_heads, 1, d_k)),
        "wv2": init((n_heads, d_model, d_k)), "bv2": init((n_heads, 1, d_k)),
        "wo2": init((n_heads, d_k, d_model)), "bo2": init((1, d_model)),
        # feed-forward
        "w1": init((d_model, d_ff)), "b1": init((1, d_ff)),
        "w2": init((d_ff, d_model)), "b2": init((1, d_model)),
        # layer norm (shared across the three norms, as in the PyTorch module)
        "gamma": (1.0 + init((1, d_model))), "beta": init((1, d_model)),
    }

    encoding = jax.random.normal(next(ks), (B, S_e, d_model), dtype=jnp.float32)
    target = jax.random.normal(next(ks), (B, S_t, d_model), dtype=jnp.float32)
    # causal mask for the decoder self-attention, all-ones for src attention
    target_mask = jnp.broadcast_to(
        jnp.tril(jnp.ones((S_t, S_t), jnp.float32)), (B, S_t, S_t))
    src_mask = jnp.ones((B, S_t, S_e), jnp.float32)

    out = decoder_layer(encoding, src_mask, target, target_mask, params,
                        n_heads=n_heads, d_k=d_k)
    out = jax.block_until_ready(out)

    ref = decoder_layer_ref(encoding, src_mask, target, target_mask, params,
                            n_heads=n_heads, d_k=d_k)
    assert out.shape == (B, S_t, d_model)
    # Tolerance loosened vs. the exact-reciprocal version because the softmax
    # denominator uses pl.reciprocal(approx=True) (EUP vrcp). Set approx=False
    # in the kernel to recover <1e-4 agreement.
    assert jnp.allclose(out, ref, atol=5e-3, rtol=5e-3), \
        f"max err {jnp.max(jnp.abs(out - ref))}"

    print("KERNEL_OK")
</pallas_src>

<mosaic_0001>
module attributes {stable_mosaic.version = 11 : i64} {
  func.func @decoder_layer_kernel(%arg0: i32, %arg1: memref<2x16x32xf32, #tpu.memory_space<vmem>>, %arg2: memref<2x8x16xf32, #tpu.memory_space<vmem>>, %arg3: memref<2x8x32xf32, #tpu.memory_space<vmem>>, %arg4: memref<2x8x8xf32, #tpu.memory_space<vmem>>, %arg5: memref<32x32xf32, #tpu.memory_space<vmem>>, %arg6: memref<1x32xf32, #tpu.memory_space<vmem>>, %arg7: memref<32x32xf32, #tpu.memory_space<vmem>>, %arg8: memref<1x32xf32, #tpu.memory_space<vmem>>, %arg9: memref<32x32xf32, #tpu.memory_space<vmem>>, %arg10: memref<1x32xf32, #tpu.memory_space<vmem>>, %arg11: memref<32x32xf32, #tpu.memory_space<vmem>>, %arg12: memref<1x32xf32, #tpu.memory_space<vmem>>, %arg13: memref<32x32xf32, #tpu.memory_space<vmem>>, %arg14: memref<1x32xf32, #tpu.memory_space<vmem>>, %arg15: memref<32x32xf32, #tpu.memory_space<vmem>>, %arg16: memref<1x32xf32, #tpu.memory_space<vmem>>, %arg17: memref<32x32xf32, #tpu.memory_space<vmem>>, %arg18: memref<1x32xf32, #tpu.memory_space<vmem>>, %arg19: memref<32x32xf32, #tpu.memory_space<vmem>>, %arg20: memref<1x32xf32, #tpu.memory_space<vmem>>, %arg21: memref<32x64xf32, #tpu.memory_space<vmem>>, %arg22: memref<1x64xf32, #tpu.memory_space<vmem>>, %arg23: memref<64x32xf32, #tpu.memory_space<vmem>>, %arg24: memref<1x32xf32, #tpu.memory_space<vmem>>, %arg25: memref<1x32xf32, #tpu.memory_space<vmem>>, %arg26: memref<1x32xf32, #tpu.memory_space<vmem>>, %arg27: memref<2x8x32xf32, #tpu.memory_space<vmem>>) attributes {dimension_semantics = [#tpu.dimension_semantics<parallel>], iteration_bounds = array<i64: 1>, scalar_prefetch = 0 : i64, scratch_operands = 0 : i64, tpu.core_type = #tpu.core_type<tc>, window_params = [{transform_indices = @transform_0, window_bounds = array<i64: 2, 16, 32>}, {transform_indices = @transform_1, window_bounds = array<i64: 2, 8, 16>}, {transform_indices = @transform_2, window_bounds = array<i64: 2, 8, 32>}, {transform_indices = @transform_3, window_bounds = array<i64: 2, 8, 8>}, {pipeline_mode = #tpu.pipeline_mode<synchronous>, transform_indices = @transform_4, window_bounds = array<i64: 32, 32>}, {pipeline_mode = #tpu.pipeline_mode<synchronous>, transform_indices = @transform_5, window_bounds = array<i64: 1, 32>}, {pipeline_mode = #tpu.pipeline_mode<synchronous>, transform_indices = @transform_6, window_bounds = array<i64: 32, 32>}, {pipeline_mode = #tpu.pipeline_mode<synchronous>, transform_indices = @transform_7, window_bounds = array<i64: 1, 32>}, {pipeline_mode = #tpu.pipeline_mode<synchronous>, transform_indices = @transform_8, window_bounds = array<i64: 32, 32>}, {pipeline_mode = #tpu.pipeline_mode<synchronous>, transform_indices = @transform_9, window_bounds = array<i64: 1, 32>}, {pipeline_mode = #tpu.pipeline_mode<synchronous>, transform_indices = @transform_10, window_bounds = array<i64: 32, 32>}, {pipeline_mode = #tpu.pipeline_mode<synchronous>, transform_indices = @transform_11, window_bounds = array<i64: 1, 32>}, {pipeline_mode = #tpu.pipeline_mode<synchronous>, transform_indices = @transform_12, window_bounds = array<i64: 32, 32>}, {pipeline_mode = #tpu.pipeline_mode<synchronous>, transform_indices = @transform_13, window_bounds = array<i64: 1, 32>}, {pipeline_mode = #tpu.pipeline_mode<synchronous>, transform_indices = @transform_14, window_bounds = array<i64: 32, 32>}, {pipeline_mode = #tpu.pipeline_mode<synchronous>, transform_indices = @transform_15, window_bounds = array<i64: 1, 32>}, {pipeline_mode = #tpu.pipeline_mode<synchronous>, transform_indices = @transform_16, window_bounds = array<i64: 32, 32>}, {pipeline_mode = #tpu.pipeline_mode<synchronous>, transform_indices = @transform_17, window_bounds = array<i64: 1, 32>}, {pipeline_mode = #tpu.pipeline_mode<synchronous>, transform_indices = @transform_18, window_bounds = array<i64: 32, 32>}, {pipeline_mode = #tpu.pipeline_mode<synchronous>, transform_indices = @transform_19, window_bounds = array<i64: 1, 32>}, {pipeline_mode = #tpu.pipeline_mode<synchronous>, transform_indices = @transform_20, window_bounds = array<i64: 32, 64>}, {pipeline_mode = #tpu.pipeline_mode<synchronous>, transform_indices = @transform_21, window_bounds = array<i64: 1, 64>}, {pipeline_mode = #tpu.pipeline_mode<synchronous>, transform_indices = @transform_22, window_bounds = array<i64: 64, 32>}, {pipeline_mode = #tpu.pipeline_mode<synchronous>, transform_indices = @transform_23, window_bounds = array<i64: 1, 32>}, {pipeline_mode = #tpu.pipeline_mode<synchronous>, transform_indices = @transform_24, window_bounds = array<i64: 1, 32>}, {pipeline_mode = #tpu.pipeline_mode<synchronous>, transform_indices = @transform_25, window_bounds = array<i64: 1, 32>}, {transform_indices = @transform_26, window_bounds = array<i64: 2, 8, 32>}]} {
    %c0 = arith.constant 0 : index
    %c0_0 = arith.constant 0 : index
    %c0_1 = arith.constant 0 : index
    %0 = vector.load %arg3[%c0, %c0_0, %c0_1] : memref<2x8x32xf32, #tpu.memory_space<vmem>>, vector<2x8x32xf32>
    %1 = vector.shape_cast %0 : vector<2x8x32xf32> to vector<16x32xf32>
    %c0_2 = arith.constant 0 : index
    %c0_3 = arith.constant 0 : index
    %c0_4 = arith.constant 0 : index
    %2 = vector.load %arg1[%c0_2, %c0_3, %c0_4] : memref<2x16x32xf32, #tpu.memory_space<vmem>>, vector<2x16x32xf32>
    %3 = vector.shape_cast %2 : vector<2x16x32xf32> to vector<32x32xf32>
    %c0_5 = arith.constant 0 : index
    %c0_6 = arith.constant 0 : index
    %c0_7 = arith.constant 0 : index
    %4 = vector.load %arg4[%c0_5, %c0_6, %c0_7] : memref<2x8x8xf32, #tpu.memory_space<vmem>>, vector<2x8x8xf32>
    %c0_8 = arith.constant 0 : index
    %c0_9 = arith.constant 0 : index
    %c0_10 = arith.constant 0 : index
    %5 = vector.load %arg2[%c0_8, %c0_9, %c0_10] : memref<2x8x16xf32, #tpu.memory_space<vmem>>, vector<2x8x16xf32>
    %c0_11 = arith.constant 0 : index
    %c0_12 = arith.constant 0 : index
    %6 = vector.load %arg25[%c0_11, %c0_12] : memref<1x32xf32, #tpu.memory_space<vmem>>, vector<1x32xf32>
    %c0_13 = arith.constant 0 : index
    %c0_14 = arith.constant 0 : index
    %7 = vector.load %arg26[%c0_13, %c0_14] : memref<1x32xf32, #tpu.memory_space<vmem>>, vector<1x32xf32>
    %c0_15 = arith.constant 0 : index
    %c0_16 = arith.constant 0 : index
    %8 = vector.load %arg5[%c0_15, %c0_16] : memref<32x32xf32, #tpu.memory_space<vmem>>, vector<32x32xf32>
    %cst = arith.constant dense<0.000000e+00> : vector<16x32xf32>
    %9 = tpu.matmul %1, %8, %cst {dimension_numbers = #tpu.dot_dimension_numbers<[1], [0], [0], [1], [0, 0, 1, 1], [], []>} : vector<16x32xf32>, vector<32x32xf32>, vector<16x32xf32> -> vector<16x32xf32>
    %c0_17 = arith.constant 0 : index
    %c0_18 = arith.constant 0 : index
    %10 = vector.load %arg6[%c0_17, %c0_18] : memref<1x32xf32, #tpu.memory_space<vmem>>, vector<1x32xf32>
    %11 = vector.broadcast %10 : vector<1x32xf32> to vector<16x32xf32>
    %12 = arith.addf %9, %11 : vector<16x32xf32>
    %13 = vector.shape_cast %12 : vector<16x32xf32> to vector<2x8x32xf32>
    %c0_19 = arith.constant 0 : index
    %c0_20 = arith.constant 0 : index
    %14 = vector.load %arg7[%c0_19, %c0_20] : memref<32x32xf32, #tpu.memory_space<vmem>>, vector<32x32xf32>
    %cst_21 = arith.constant dense<0.000000e+00> : vector<16x32xf32>
    %15 = tpu.matmul %1, %14, %cst_21 {dimension_numbers = #tpu.dot_dimension_numbers<[1], [0], [0], [1], [0, 0, 1, 1], [], []>} : vector<16x32xf32>, vector<32x32xf32>, vector<16x32xf32> -> vector<16x32xf32>
    %c0_22 = arith.constant 0 : index
    %c0_23 = arith.constant 0 : index
    %16 = vector.load %arg8[%c0_22, %c0_23] : memref<1x32xf32, #tpu.memory_space<vmem>>, vector<1x32xf32>
    %17 = vector.broadcast %16 : vector<1x32xf32> to vector<16x32xf32>
    %18 = arith.addf %15, %17 : vector<16x32xf32>
    %19 = vector.shape_cast %18 : vector<16x32xf32> to vector<2x8x32xf32>
    %c0_24 = arith.constant 0 : index
    %c0_25 = arith.constant 0 : index
    %20 = vector.load %arg9[%c0_24, %c0_25] : memref<32x32xf32, #tpu.memory_space<vmem>>, vector<32x32xf32>
    %cst_26 = arith.constant dense<0.000000e+00> : vector<16x32xf32>
    %21 = tpu.matmul %1, %20, %cst_26 {dimension_numbers = #tpu.dot_dimension_numbers<[1], [0], [0], [1], [0, 0, 1, 1], [], []>} : vector<16x32xf32>, vector<32x32xf32>, vector<16x32xf32> -> vector<16x32xf32>
    %c0_27 = arith.constant 0 : index
    %c0_28 = arith.constant 0 : index
    %22 = vector.load %arg10[%c0_27, %c0_28] : memref<1x32xf32, #tpu.memory_space<vmem>>, vector<1x32xf32>
    %23 = vector.broadcast %22 : vector<1x32xf32> to vector<16x32xf32>
    %24 = arith.addf %21, %23 : vector<16x32xf32>
    %25 = vector.shape_cast %24 : vector<16x32xf32> to vector<2x8x32xf32>
    %26 = vector.extract_strided_slice %13 {offsets = [0, 0, 0], sizes = [2, 8, 8], strides = [1, 1, 1]} : vector<2x8x32xf32> to vector<2x8x8xf32>
    %27 = vector.extract_strided_slice %19 {offsets = [0, 0, 0], sizes = [2, 8, 8], strides = [1, 1, 1]} : vector<2x8x32xf32> to vector<2x8x8xf32>
    %28 = vector.extract_strided_slice %25 {offsets = [0, 0, 0], sizes = [2, 8, 8], strides = [1, 1, 1]} : vector<2x8x32xf32> to vector<2x8x8xf32>
    "tpu.trace_start"() <{level = 10 : i32, message = "bqd,bkd->bqk"}> : () -> ()
    %cst_29 = arith.constant dense<0.000000e+00> : vector<2x8x8xf32>
    %29 = tpu.matmul %26, %27, %cst_29 {dimension_numbers = #tpu.dot_dimension_numbers<[2], [2], [1], [1], [0, 0, 0, 1, 1, 1], [0], [0]>} : vector<2x8x8xf32>, vector<2x8x8xf32>, vector<2x8x8xf32> -> vector<2x8x8xf32>
    "tpu.trace_stop"() : () -> ()
    %cst_30 = arith.constant 0.353553385 : f32
    %30 = vector.broadcast %cst_30 : f32 to vector<2x8x8xf32>
    %31 = arith.mulf %29, %30 : vector<2x8x8xf32>
    %32 = arith.addf %31, %4 : vector<2x8x8xf32>
    %cst_31 = arith.constant dense<0xFF800000> : vector<2x8xf32>
    %33 = vector.multi_reduction <maximumf>, %32, %cst_31 [2] : vector<2x8x8xf32> to vector<2x8xf32>
    %34 = vector.shape_cast %33 : vector<2x8xf32> to vector<2x8x1xf32>
    %35 = vector.broadcast %34 : vector<2x8x1xf32> to vector<2x8x8xf32>
    %36 = arith.subf %32, %35 : vector<2x8x8xf32>
    %37 = math.exp %36 : vector<2x8x8xf32>
    %cst_32 = arith.constant dense<0.000000e+00> : vector<2x8xf32>
    %38 = vector.multi_reduction <add>, %37, %cst_32 [2] : vector<2x8x8xf32> to vector<2x8xf32>
    %39 = vector.shape_cast %38 : vector<2x8xf32> to vector<2x8x1xf32>
    %40 = tpu.reciprocal %39 {approx = true} : vector<2x8x1xf32> -> vector<2x8x1xf32>
    %41 = vector.broadcast %40 : vector<2x8x1xf32> to vector<2x8x8xf32>
    %42 = arith.mulf %37, %41 : vector<2x8x8xf32>
    "tpu.trace_start"() <{level = 10 : i32, message = "bqk,bkd->bqd"}> : () -> ()
    %cst_33 = arith.constant dense<0.000000e+00> : vector<2x8x8xf32>
    %43 = tpu.matmul %42, %28, %cst_33 {dimension_numbers = #tpu.dot_dimension_numbers<[2], [1], [1], [2], [0, 0, 0, 1, 1, 2], [0], [0]>} : vector<2x8x8xf32>, vector<2x8x8xf32>, vector<2x8x8xf32> -> vector<2x8x8xf32>
    "tpu.trace_stop"() : () -> ()
    %44 = vector.extract_strided_slice %13 {offsets = [0, 0, 8], sizes = [2, 8, 8], strides = [1, 1, 1]} : vector<2x8x32xf32> to vector<2x8x8xf32>
    %45 = vector.extract_strided_slice %19 {offsets = [0, 0, 8], sizes = [2, 8, 8], strides = [1, 1, 1]} : vector<2x8x32xf32> to vector<2x8x8xf32>
    %46 = vector.extract_strided_slice %25 {offsets = [0, 0, 8], sizes = [2, 8, 8], strides = [1, 1, 1]} : vector<2x8x32xf32> to vector<2x8x8xf32>
    "tpu.trace_start"() <{level = 10 : i32, message = "bqd,bkd->bqk"}> : () -> ()
    %cst_34 = arith.constant dense<0.000000e+00> : vector<2x8x8xf32>
    %47 = tpu.matmul %44, %45, %cst_34 {dimension_numbers = #tpu.dot_dimension_numbers<[2], [2], [1], [1], [0, 0, 0, 1, 1, 1], [0], [0]>} : vector<2x8x8xf32>, vector<2x8x8xf32>, vector<2x8x8xf32> -> vector<2x8x8xf32>
    "tpu.trace_stop"() : () -> ()
    %cst_35 = arith.constant 0.353553385 : f32
    %48 = vector.broadcast %cst_35 : f32 to vector<2x8x8xf32>
    %49 = arith.mulf %47, %48 : vector<2x8x8xf32>
    %50 = arith.addf %49, %4 : vector<2x8x8xf32>
    %cst_36 = arith.constant dense<0xFF800000> : vector<2x8xf32>
    %51 = vector.multi_reduction <maximumf>, %50, %cst_36 [2] : vector<2x8x8xf32> to vector<2x8xf32>
    %52 = vector.shape_cast %51 : vector<2x8xf32> to vector<2x8x1xf32>
    %53 = vector.broadcast %52 : vector<2x8x1xf32> to vector<2x8x8xf32>
    %54 = arith.subf %50, %53 : vector<2x8x8xf32>
    %55 = math.exp %54 : vector<2x8x8xf32>
    %cst_37 = arith.constant dense<0.000000e+00> : vector<2x8xf32>
    %56 = vector.multi_reduction <add>, %55, %cst_37 [2] : vector<2x8x8xf32> to vector<2x8xf32>
    %57 = vector.shape_cast %56 : vector<2x8xf32> to vector<2x8x1xf32>
    %58 = tpu.reciprocal %57 {approx = true} : vector<2x8x1xf32> -> vector<2x8x1xf32>
    %59 = vector.broadcast %58 : vector<2x8x1xf32> to vector<2x8x8xf32>
    %60 = arith.mulf %55, %59 : vector<2x8x8xf32>
    "tpu.trace_start"() <{level = 10 : i32, message = "bqk,bkd->bqd"}> : () -> ()
    %cst_38 = arith.constant dense<0.000000e+00> : vector<2x8x8xf32>
    %61 = tpu.matmul %60, %46, %cst_38 {dimension_numbers = #tpu.dot_dimension_numbers<[2], [1], [1], [2], [0, 0, 0, 1, 1, 2], [0], [0]>} : vector<2x8x8xf32>, vector<2x8x8xf32>, vector<2x8x8xf32> -> vector<2x8x8xf32>
    "tpu.trace_stop"() : () -> ()
    %62 = vector.extract_strided_slice %13 {offsets = [0, 0, 16], sizes = [2, 8, 8], strides = [1, 1, 1]} : vector<2x8x32xf32> to vector<2x8x8xf32>
    %63 = vector.extract_strided_slice %19 {offsets = [0, 0, 16], sizes = [2, 8, 8], strides = [1, 1, 1]} : vector<2x8x32xf32> to vector<2x8x8xf32>
    %64 = vector.extract_strided_slice %25 {offsets = [0, 0, 16], sizes = [2, 8, 8], strides = [1, 1, 1]} : vector<2x8x32xf32> to vector<2x8x8xf32>
    "tpu.trace_start"() <{level = 10 : i32, message = "bqd,bkd->bqk"}> : () -> ()
    %cst_39 = arith.constant dense<0.000000e+00> : vector<2x8x8xf32>
    %65 = tpu.matmul %62, %63, %cst_39 {dimension_numbers = #tpu.dot_dimension_numbers<[2], [2], [1], [1], [0, 0, 0, 1, 1, 1], [0], [0]>} : vector<2x8x8xf32>, vector<2x8x8xf32>, vector<2x8x8xf32> -> vector<2x8x8xf32>
    "tpu.trace_stop"() : () -> ()
    %cst_40 = arith.constant 0.353553385 : f32
    %66 = vector.broadcast %cst_40 : f32 to vector<2x8x8xf32>
    %67 = arith.mulf %65, %66 : vector<2x8x8xf32>
    %68 = arith.addf %67, %4 : vector<2x8x8xf32>
    %cst_41 = arith.constant dense<0xFF800000> : vector<2x8xf32>
    %69 = vector.multi_reduction <maximumf>, %68, %cst_41 [2] : vector<2x8x8xf32> to vector<2x8xf32>
    %70 = vector.shape_cast %69 : vector<2x8xf32> to vector<2x8x1xf32>
    %71 = vector.broadcast %70 : vector<2x8x1xf32> to vector<2x8x8xf32>
    %72 = arith.subf %68, %71 : vector<2x8x8xf32>
    %73 = math.exp %72 : vector<2x8x8xf32>
    %cst_42 = arith.constant dense<0.000000e+00> : vector<2x8xf32>
    %74 = vector.multi_reduction <add>, %73, %cst_42 [2] : vector<2x8x8xf32> to vector<2x8xf32>
    %75 = vector.shape_cast %74 : vector<2x8xf32> to vector<2x8x1xf32>
    %76 = tpu.reciprocal %75 {approx = true} : vector<2x8x1xf32> -> vector<2x8x1xf32>
    %77 = vector.broadcast %76 : vector<2x8x1xf32> to vector<2x8x8xf32>
    %78 = arith.mulf %73, %77 : vector<2x8x8xf32>
    "tpu.trace_start"() <{level = 10 : i32, message = "bqk,bkd->bqd"}> : () -> ()
    %cst_43 = arith.constant dense<0.000000e+00> : vector<2x8x8xf32>
    %79 = tpu.matmul %78, %64, %cst_43 {dimension_numbers = #tpu.dot_dimension_numbers<[2], [1], [1], [2], [0, 0, 0, 1, 1, 2], [0], [0]>} : vector<2x8x8xf32>, vector<2x8x8xf32>, vector<2x8x8xf32> -> vector<2x8x8xf32>
    "tpu.trace_stop"() : () -> ()
    %80 = vector.extract_strided_slice %13 {offsets = [0, 0, 24], sizes = [2, 8, 8], strides = [1, 1, 1]} : vector<2x8x32xf32> to vector<2x8x8xf32>
    %81 = vector.extract_strided_slice %19 {offsets = [0, 0, 24], sizes = [2, 8, 8], strides = [1, 1, 1]} : vector<2x8x32xf32> to vector<2x8x8xf32>
    %82 = vector.extract_strided_slice %25 {offsets = [0, 0, 24], sizes = [2, 8, 8], strides = [1, 1, 1]} : vector<2x8x32xf32> to vector<2x8x8xf32>
    "tpu.trace_start"() <{level = 10 : i32, message = "bqd,bkd->bqk"}> : () -> ()
    %cst_44 = arith.constant dense<0.000000e+00> : vector<2x8x8xf32>
    %83 = tpu.matmul %80, %81, %cst_44 {dimension_numbers = #tpu.dot_dimension_numbers<[2], [2], [1], [1], [0, 0, 0, 1, 1, 1], [0], [0]>} : vector<2x8x8xf32>, vector<2x8x8xf32>, vector<2x8x8xf32> -> vector<2x8x8xf32>
    "tpu.trace_stop"() : () -> ()
    %cst_45 = arith.constant 0.353553385 : f32
    %84 = vector.broadcast %cst_45 : f32 to vector<2x8x8xf32>
    %85 = arith.mulf %83, %84 : vector<2x8x8xf32>
    %86 = arith.addf %85, %4 : vector<2x8x8xf32>
    %cst_46 = arith.constant dense<0xFF800000> : vector<2x8xf32>
    %87 = vector.multi_reduction <maximumf>, %86, %cst_46 [2] : vector<2x8x8xf32> to vector<2x8xf32>
    %88 = vector.shape_cast %87 : vector<2x8xf32> to vector<2x8x1xf32>
    %89 = vector.broadcast %88 : vector<2x8x1xf32> to vector<2x8x8xf32>
    %90 = arith.subf %86, %89 : vector<2x8x8xf32>
    %91 = math.exp %90 : vector<2x8x8xf32>
    %cst_47 = arith.constant dense<0.000000e+00> : vector<2x8xf32>
    %92 = vector.multi_reduction <add>, %91, %cst_47 [2] : vector<2x8x8xf32> to vector<2x8xf32>
    %93 = vector.shape_cast %92 : vector<2x8xf32> to vector<2x8x1xf32>
    %94 = tpu.reciprocal %93 {approx = true} : vector<2x8x1xf32> -> vector<2x8x1xf32>
    %95 = vector.broadcast %94 : vector<2x8x1xf32> to vector<2x8x8xf32>
    %96 = arith.mulf %91, %95 : vector<2x8x8xf32>
    "tpu.trace_start"() <{level = 10 : i32, message = "bqk,bkd->bqd"}> : () -> ()
    %cst_48 = arith.constant dense<0.000000e+00> : vector<2x8x8xf32>
    %97 = tpu.matmul %96, %82, %cst_48 {dimension_numbers = #tpu.dot_dimension_numbers<[2], [1], [1], [2], [0, 0, 0, 1, 1, 2], [0], [0]>} : vector<2x8x8xf32>, vector<2x8x8xf32>, vector<2x8x8xf32> -> vector<2x8x8xf32>
    "tpu.trace_stop"() : () -> ()
    %98 = tpu.concatenate %43, %61, %79, %97 in 2 : vector<2x8x8xf32>, vector<2x8x8xf32>, vector<2x8x8xf32>, vector<2x8x8xf32> -> vector<2x8x32xf32>
    %99 = vector.shape_cast %98 : vector<2x8x32xf32> to vector<16x32xf32>
    %c0_49 = arith.constant 0 : index
    %c0_50 = arith.constant 0 : index
    %100 = vector.load %arg11[%c0_49, %c0_50] : memref<32x32xf32, #tpu.memory_space<vmem>>, vector<32x32xf32>
    %cst_51 = arith.constant dense<0.000000e+00> : vector<16x32xf32>
    %101 = tpu.matmul %99, %100, %cst_51 {dimension_numbers = #tpu.dot_dimension_numbers<[1], [0], [0], [1], [0, 0, 1, 1], [], []>} : vector<16x32xf32>, vector<32x32xf32>, vector<16x32xf32> -> vector<16x32xf32>
    %c0_52 = arith.constant 0 : index
    %c0_53 = arith.constant 0 : index
    %102 = vector.load %arg12[%c0_52, %c0_53] : memref<1x32xf32, #tpu.memory_space<vmem>>, vector<1x32xf32>
    %103 = vector.broadcast %102 : vector<1x32xf32> to vector<16x32xf32>
    %104 = arith.addf %101, %103 : vector<16x32xf32>
    %105 = arith.addf %1, %104 : vector<16x32xf32>
    %cst_54 = arith.constant dense<0.000000e+00> : vector<16xf32>
    %106 = vector.multi_reduction <add>, %105, %cst_54 [1] : vector<16x32xf32> to vector<16xf32>
    %107 = vector.shape_cast %106 : vector<16xf32> to vector<16x1xf32>
    %cst_55 = arith.constant 3.200000e+01 : f32
    %108 = vector.broadcast %cst_55 : f32 to vector<16x1xf32>
    %109 = arith.divf %107, %108 : vector<16x1xf32>
    %110 = vector.broadcast %109 : vector<16x1xf32> to vector<16x32xf32>
    %111 = arith.subf %105, %110 : vector<16x32xf32>
    %112 = vector.broadcast %109 : vector<16x1xf32> to vector<16x32xf32>
    %113 = arith.subf %105, %112 : vector<16x32xf32>
    %114 = arith.mulf %111, %113 : vector<16x32xf32>
    %cst_56 = arith.constant dense<0.000000e+00> : vector<16xf32>
    %115 = vector.multi_reduction <add>, %114, %cst_56 [1] : vector<16x32xf32> to vector<16xf32>
    %116 = vector.shape_cast %115 : vector<16xf32> to vector<16x1xf32>
    %cst_57 = arith.constant 3.200000e+01 : f32
    %117 = vector.broadcast %cst_57 : f32 to vector<16x1xf32>
    %118 = arith.divf %116, %117 : vector<16x1xf32>
    %119 = vector.broadcast %109 : vector<16x1xf32> to vector<16x32xf32>
    %120 = arith.subf %105, %119 : vector<16x32xf32>
    %cst_58 = arith.constant 9.99999974E-6 : f32
    %121 = vector.broadcast %cst_58 : f32 to vector<16x1xf32>
    %122 = arith.addf %118, %121 : vector<16x1xf32>
    %123 = math.rsqrt %122 : vector<16x1xf32>
    %124 = vector.broadcast %123 : vector<16x1xf32> to vector<16x32xf32>
    %125 = arith.mulf %120, %124 : vector<16x32xf32>
    %126 = vector.broadcast %6 : vector<1x32xf32> to vector<16x32xf32>
    %127 = arith.mulf %125, %126 : vector<16x32xf32>
    %128 = vector.broadcast %7 : vector<1x32xf32> to vector<16x32xf32>
    %129 = arith.addf %127, %128 : vector<16x32xf32>
    %c0_59 = arith.constant 0 : index
    %c0_60 = arith.constant 0 : index
    %130 = vector.load %arg13[%c0_59, %c0_60] : memref<32x32xf32, #tpu.memory_space<vmem>>, vector<32x32xf32>
    %cst_61 = arith.constant dense<0.000000e+00> : vector<16x32xf32>
    %131 = tpu.matmul %129, %130, %cst_61 {dimension_numbers = #tpu.dot_dimension_numbers<[1], [0], [0], [1], [0, 0, 1, 1], [], []>} : vector<16x32xf32>, vector<32x32xf32>, vector<16x32xf32> -> vector<16x32xf32>
    %c0_62 = arith.constant 0 : index
    %c0_63 = arith.constant 0 : index
    %132 = vector.load %arg14[%c0_62, %c0_63] : memref<1x32xf32, #tpu.memory_space<vmem>>, vector<1x32xf32>
    %133 = vector.broadcast %132 : vector<1x32xf32> to vector<16x32xf32>
    %134 = arith.addf %131, %133 : vector<16x32xf32>
    %135 = vector.shape_cast %134 : vector<16x32xf32> to vector<2x8x32xf32>
    %c0_64 = arith.constant 0 : index
    %c0_65 = arith.constant 0 : index
    %136 = vector.load %arg15[%c0_64, %c0_65] : memref<32x32xf32, #tpu.memory_space<vmem>>, vector<32x32xf32>
    %cst_66 = arith.constant dense<0.000000e+00> : vector<32x32xf32>
    %137 = tpu.matmul %3, %136, %cst_66 {dimension_numbers = #tpu.dot_dimension_numbers<[1], [0], [0], [1], [0, 0, 1, 1], [], []>} : vector<32x32xf32>, vector<32x32xf32>, vector<32x32xf32> -> vector<32x32xf32>
    %c0_67 = arith.constant 0 : index
    %c0_68 = arith.constant 0 : index
    %138 = vector.load %arg16[%c0_67, %c0_68] : memref<1x32xf32, #tpu.memory_space<vmem>>, vector<1x32xf32>
    %139 = vector.broadcast %138 : vector<1x32xf32> to vector<32x32xf32>
    %140 = arith.addf %137, %139 : vector<32x32xf32>
    %141 = vector.shape_cast %140 : vector<32x32xf32> to vector<2x16x32xf32>
    %c0_69 = arith.constant 0 : index
    %c0_70 = arith.constant 0 : index
    %142 = vector.load %arg17[%c0_69, %c0_70] : memref<32x32xf32, #tpu.memory_space<vmem>>, vector<32x32xf32>
    %cst_71 = arith.constant dense<0.000000e+00> : vector<32x32xf32>
    %143 = tpu.matmul %3, %142, %cst_71 {dimension_numbers = #tpu.dot_dimension_numbers<[1], [0], [0], [1], [0, 0, 1, 1], [], []>} : vector<32x32xf32>, vector<32x32xf32>, vector<32x32xf32> -> vector<32x32xf32>
    %c0_72 = arith.constant 0 : index
    %c0_73 = arith.constant 0 : index
    %144 = vector.load %arg18[%c0_72, %c0_73] : memref<1x32xf32, #tpu.memory_space<vmem>>, vector<1x32xf32>
    %145 = vector.broadcast %144 : vector<1x32xf32> to vector<32x32xf32>
    %146 = arith.addf %143, %145 : vector<32x32xf32>
    %147 = vector.shape_cast %146 : vector<32x32xf32> to vector<2x16x32xf32>
    %148 = vector.extract_strided_slice %135 {offsets = [0, 0, 0], sizes = [2, 8, 8], strides = [1, 1, 1]} : vector<2x8x32xf32> to vector<2x8x8xf32>
    %149 = vector.extract_strided_slice %141 {offsets = [0, 0, 0], sizes = [2, 16, 8], strides = [1, 1, 1]} : vector<2x16x32xf32> to vector<2x16x8xf32>
    %150 = vector.extract_strided_slice %147 {offsets = [0, 0, 0], sizes = [2, 16, 8], strides = [1, 1, 1]} : vector<2x16x32xf32> to vector<2x16x8xf32>
    "tpu.trace_start"() <{level = 10 : i32, message = "bqd,bkd->bqk"}> : () -> ()
    %cst_74 = arith.constant dense<0.000000e+00> : vector<2x8x16xf32>
    %151 = tpu.matmul %148, %149, %cst_74 {dimension_numbers = #tpu.dot_dimension_numbers<[2], [2], [1], [1], [0, 0, 0, 1, 1, 1], [0], [0]>} : vector<2x8x8xf32>, vector<2x16x8xf32>, vector<2x8x16xf32> -> vector<2x8x16xf32>
    "tpu.trace_stop"() : () -> ()
    %cst_75 = arith.constant 0.353553385 : f32
    %152 = vector.broadcast %cst_75 : f32 to vector<2x8x16xf32>
    %153 = arith.mulf %151, %152 : vector<2x8x16xf32>
    %154 = arith.addf %153, %5 : vector<2x8x16xf32>
    %cst_76 = arith.constant dense<0xFF800000> : vector<2x8xf32>
    %155 = vector.multi_reduction <maximumf>, %154, %cst_76 [2] : vector<2x8x16xf32> to vector<2x8xf32>
    %156 = vector.shape_cast %155 : vector<2x8xf32> to vector<2x8x1xf32>
    %157 = vector.broadcast %156 : vector<2x8x1xf32> to vector<2x8x16xf32>
    %158 = arith.subf %154, %157 : vector<2x8x16xf32>
    %159 = math.exp %158 : vector<2x8x16xf32>
    %cst_77 = arith.constant dense<0.000000e+00> : vector<2x8xf32>
    %160 = vector.multi_reduction <add>, %159, %cst_77 [2] : vector<2x8x16xf32> to vector<2x8xf32>
    %161 = vector.shape_cast %160 : vector<2x8xf32> to vector<2x8x1xf32>
    %162 = tpu.reciprocal %161 {approx = true} : vector<2x8x1xf32> -> vector<2x8x1xf32>
    %163 = vector.broadcast %162 : vector<2x8x1xf32> to vector<2x8x16xf32>
    %164 = arith.mulf %159, %163 : vector<2x8x16xf32>
    "tpu.trace_start"() <{level = 10 : i32, message = "bqk,bkd->bqd"}> : () -> ()
    %cst_78 = arith.constant dense<0.000000e+00> : vector<2x8x8xf32>
    %165 = tpu.matmul %164, %150, %cst_78 {dimension_numbers = #tpu.dot_dimension_numbers<[2], [1], [1], [2], [0, 0, 0, 1, 1, 2], [0], [0]>} : vector<2x8x16xf32>, vector<2x16x8xf32>, vector<2x8x8xf32> -> vector<2x8x8xf32>
    "tpu.trace_stop"() : () -> ()
    %166 = vector.extract_strided_slice %135 {offsets = [0, 0, 8], sizes = [2, 8, 8], strides = [1, 1, 1]} : vector<2x8x32xf32> to vector<2x8x8xf32>
    %167 = vector.extract_strided_slice %141 {offsets = [0, 0, 8], sizes = [2, 16, 8], strides = [1, 1, 1]} : vector<2x16x32xf32> to vector<2x16x8xf32>
    %168 = vector.extract_strided_slice %147 {offsets = [0, 0, 8], sizes = [2, 16, 8], strides = [1, 1, 1]} : vector<2x16x32xf32> to vector<2x16x8xf32>
    "tpu.trace_start"() <{level = 10 : i32, message = "bqd,bkd->bqk"}> : () -> ()
    %cst_79 = arith.constant dense<0.000000e+00> : vector<2x8x16xf32>
    %169 = tpu.matmul %166, %167, %cst_79 {dimension_numbers = #tpu.dot_dimension_numbers<[2], [2], [1], [1], [0, 0, 0, 1, 1, 1], [0], [0]>} : vector<2x8x8xf32>, vector<2x16x8xf32>, vector<2x8x16xf32> -> vector<2x8x16xf32>
    "tpu.trace_stop"() : () -> ()
    %cst_80 = arith.constant 0.353553385 : f32
    %170 = vector.broadcast %cst_80 : f32 to vector<2x8x16xf32>
    %171 = arith.mulf %169, %170 : vector<2x8x16xf32>
    %172 = arith.addf %171, %5 : vector<2x8x16xf32>
    %cst_81 = arith.constant dense<0xFF800000> : vector<2x8xf32>
    %173 = vector.multi_reduction <maximumf>, %172, %cst_81 [2] : vector<2x8x16xf32> to vector<2x8xf32>
    %174 = vector.shape_cast %173 : vector<2x8xf32> to vector<2x8x1xf32>
    %175 = vector.broadcast %174 : vector<2x8x1xf32> to vector<2x8x16xf32>
    %176 = arith.subf %172, %175 : vector<2x8x16xf32>
    %177 = math.exp %176 : vector<2x8x16xf32>
    %cst_82 = arith.constant dense<0.000000e+00> : vector<2x8xf32>
    %178 = vector.multi_reduction <add>, %177, %cst_82 [2] : vector<2x8x16xf32> to vector<2x8xf32>
    %179 = vector.shape_cast %178 : vector<2x8xf32> to vector<2x8x1xf32>
    %180 = tpu.reciprocal %179 {approx = true} : vector<2x8x1xf32> -> vector<2x8x1xf32>
    %181 = vector.broadcast %180 : vector<2x8x1xf32> to vector<2x8x16xf32>
    %182 = arith.mulf %177, %181 : vector<2x8x16xf32>
    "tpu.trace_start"() <{level = 10 : i32, message = "bqk,bkd->bqd"}> : () -> ()
    %cst_83 = arith.constant dense<0.000000e+00> : vector<2x8x8xf32>
    %183 = tpu.matmul %182, %168, %cst_83 {dimension_numbers = #tpu.dot_dimension_numbers<[2], [1], [1], [2], [0, 0, 0, 1, 1, 2], [0], [0]>} : vector<2x8x16xf32>, vector<2x16x8xf32>, vector<2x8x8xf32> -> vector<2x8x8xf32>
    "tpu.trace_stop"() : () -> ()
    %184 = vector.extract_strided_slice %135 {offsets = [0, 0, 16], sizes = [2, 8, 8], strides = [1, 1, 1]} : vector<2x8x32xf32> to vector<2x8x8xf32>
    %185 = vector.extract_strided_slice %141 {offsets = [0, 0, 16], sizes = [2, 16, 8], strides = [1, 1, 1]} : vector<2x16x32xf32> to vector<2x16x8xf32>
    %186 = vector.extract_strided_slice %147 {offsets = [0, 0, 16], sizes = [2, 16, 8], strides = [1, 1, 1]} : vector<2x16x32xf32> to vector<2x16x8xf32>
    "tpu.trace_start"() <{level = 10 : i32, message = "bqd,bkd->bqk"}> : () -> ()
    %cst_84 = arith.constant dense<0.000000e+00> : vector<2x8x16xf32>
    %187 = tpu.matmul %184, %185, %cst_84 {dimension_numbers = #tpu.dot_dimension_numbers<[2], [2], [1], [1], [0, 0, 0, 1, 1, 1], [0], [0]>} : vector<2x8x8xf32>, vector<2x16x8xf32>, vector<2x8x16xf32> -> vector<2x8x16xf32>
    "tpu.trace_stop"() : () -> ()
    %cst_85 = arith.constant 0.353553385 : f32
    %188 = vector.broadcast %cst_85 : f32 to vector<2x8x16xf32>
    %189 = arith.mulf %187, %188 : vector<2x8x16xf32>
    %190 = arith.addf %189, %5 : vector<2x8x16xf32>
    %cst_86 = arith.constant dense<0xFF800000> : vector<2x8xf32>
    %191 = vector.multi_reduction <maximumf>, %190, %cst_86 [2] : vector<2x8x16xf32> to vector<2x8xf32>
    %192 = vector.shape_cast %191 : vector<2x8xf32> to vector<2x8x1xf32>
    %193 = vector.broadcast %192 : vector<2x8x1xf32> to vector<2x8x16xf32>
    %194 = arith.subf %190, %193 : vector<2x8x16xf32>
    %195 = math.exp %194 : vector<2x8x16xf32>
    %cst_87 = arith.constant dense<0.000000e+00> : vector<2x8xf32>
    %196 = vector.multi_reduction <add>, %195, %cst_87 [2] : vector<2x8x16xf32> to vector<2x8xf32>
    %197 = vector.shape_cast %196 : vector<2x8xf32> to vector<2x8x1xf32>
    %198 = tpu.reciprocal %197 {approx = true} : vector<2x8x1xf32> -> vector<2x8x1xf32>
    %199 = vector.broadcast %198 : vector<2x8x1xf32> to vector<2x8x16xf32>
    %200 = arith.mulf %195, %199 : vector<2x8x16xf32>
    "tpu.trace_start"() <{level = 10 : i32, message = "bqk,bkd->bqd"}> : () -> ()
    %cst_88 = arith.constant dense<0.000000e+00> : vector<2x8x8xf32>
    %201 = tpu.matmul %200, %186, %cst_88 {dimension_numbers = #tpu.dot_dimension_numbers<[2], [1], [1], [2], [0, 0, 0, 1, 1, 2], [0], [0]>} : vector<2x8x16xf32>, vector<2x16x8xf32>, vector<2x8x8xf32> -> vector<2x8x8xf32>
    "tpu.trace_stop"() : () -> ()
    %202 = vector.extract_strided_slice %135 {offsets = [0, 0, 24], sizes = [2, 8, 8], strides = [1, 1, 1]} : vector<2x8x32xf32> to vector<2x8x8xf32>
    %203 = vector.extract_strided_slice %141 {offsets = [0, 0, 24], sizes = [2, 16, 8], strides = [1, 1, 1]} : vector<2x16x32xf32> to vector<2x16x8xf32>
    %204 = vector.extract_strided_slice %147 {offsets = [0, 0, 24], sizes = [2, 16, 8], strides = [1, 1, 1]} : vector<2x16x32xf32> to vector<2x16x8xf32>
    "tpu.trace_start"() <{level = 10 : i32, message = "bqd,bkd->bqk"}> : () -> ()
    %cst_89 = arith.constant dense<0.000000e+00> : vector<2x8x16xf32>
    %205 = tpu.matmul %202, %203, %cst_89 {dimension_numbers = #tpu.dot_dimension_numbers<[2], [2], [1], [1], [0, 0, 0, 1, 1, 1], [0], [0]>} : vector<2x8x8xf32>, vector<2x16x8xf32>, vector<2x8x16xf32> -> vector<2x8x16xf32>
    "tpu.trace_stop"() : () -> ()
    %cst_90 = arith.constant 0.353553385 : f32
    %206 = vector.broadcast %cst_90 : f32 to vector<2x8x16xf32>
    %207 = arith.mulf %205, %206 : vector<2x8x16xf32>
    %208 = arith.addf %207, %5 : vector<2x8x16xf32>
    %cst_91 = arith.constant dense<0xFF800000> : vector<2x8xf32>
    %209 = vector.multi_reduction <maximumf>, %208, %cst_91 [2] : vector<2x8x16xf32> to vector<2x8xf32>
    %210 = vector.shape_cast %209 : vector<2x8xf32> to vector<2x8x1xf32>
    %211 = vector.broadcast %210 : vector<2x8x1xf32> to vector<2x8x16xf32>
    %212 = arith.subf %208, %211 : vector<2x8x16xf32>
    %213 = math.exp %212 : vector<2x8x16xf32>
    %cst_92 = arith.constant dense<0.000000e+00> : vector<2x8xf32>
    %214 = vector.multi_reduction <add>, %213, %cst_92 [2] : vector<2x8x16xf32> to vector<2x8xf32>
    %215 = vector.shape_cast %214 : vector<2x8xf32> to vector<2x8x1xf32>
    %216 = tpu.reciprocal %215 {approx = true} : vector<2x8x1xf32> -> vector<2x8x1xf32>
    %217 = vector.broadcast %216 : vector<2x8x1xf32> to vector<2x8x16xf32>
    %218 = arith.mulf %213, %217 : vector<2x8x16xf32>
    "tpu.trace_start"() <{level = 10 : i32, message = "bqk,bkd->bqd"}> : () -> ()
    %cst_93 = arith.constant dense<0.000000e+00> : vector<2x8x8xf32>
    %219 = tpu.matmul %218, %204, %cst_93 {dimension_numbers = #tpu.dot_dimension_numbers<[2], [1], [1], [2], [0, 0, 0, 1, 1, 2], [0], [0]>} : vector<2x8x16xf32>, vector<2x16x8xf32>, vector<2x8x8xf32> -> vector<2x8x8xf32>
    "tpu.trace_stop"() : () -> ()
    %220 = tpu.concatenate %165, %183, %201, %219 in 2 : vector<2x8x8xf32>, vector<2x8x8xf32>, vector<2x8x8xf32>, vector<2x8x8xf32> -> vector<2x8x32xf32>
    %221 = vector.shape_cast %220 : vector<2x8x32xf32> to vector<16x32xf32>
    %c0_94 = arith.constant 0 : index
    %c0_95 = arith.constant 0 : index
    %222 = vector.load %arg19[%c0_94, %c0_95] : memref<32x32xf32, #tpu.memory_space<vmem>>, vector<32x32xf32>
    %cst_96 = arith.constant dense<0.000000e+00> : vector<16x32xf32>
    %223 = tpu.matmul %221, %222, %cst_96 {dimension_numbers = #tpu.dot_dimension_numbers<[1], [0], [0], [1], [0, 0, 1, 1], [], []>} : vector<16x32xf32>, vector<32x32xf32>, vector<16x32xf32> -> vector<16x32xf32>
    %c0_97 = arith.constant 0 : index
    %c0_98 = arith.constant 0 : index
    %224 = vector.load %arg20[%c0_97, %c0_98] : memref<1x32xf32, #tpu.memory_space<vmem>>, vector<1x32xf32>
    %225 = vector.broadcast %224 : vector<1x32xf32> to vector<16x32xf32>
    %226 = arith.addf %223, %225 : vector<16x32xf32>
    %227 = arith.addf %129, %226 : vector<16x32xf32>
    %cst_99 = arith.constant dense<0.000000e+00> : vector<16xf32>
    %228 = vector.multi_reduction <add>, %227, %cst_99 [1] : vector<16x32xf32> to vector<16xf32>
    %229 = vector.shape_cast %228 : vector<16xf32> to vector<16x1xf32>
    %cst_100 = arith.constant 3.200000e+01 : f32
    %230 = vector.broadcast %cst_100 : f32 to vector<16x1xf32>
    %231 = arith.divf %229, %230 : vector<16x1xf32>
    %232 = vector.broadcast %231 : vector<16x1xf32> to vector<16x32xf32>
    %233 = arith.subf %227, %232 : vector<16x32xf32>
    %234 = vector.broadcast %231 : vector<16x1xf32> to vector<16x32xf32>
    %235 = arith.subf %227, %234 : vector<16x32xf32>
    %236 = arith.mulf %233, %235 : vector<16x32xf32>
    %cst_101 = arith.constant dense<0.000000e+00> : vector<16xf32>
    %237 = vector.multi_reduction <add>, %236, %cst_101 [1] : vector<16x32xf32> to vector<16xf32>
    %238 = vector.shape_cast %237 : vector<16xf32> to vector<16x1xf32>
    %cst_102 = arith.constant 3.200000e+01 : f32
    %239 = vector.broadcast %cst_102 : f32 to vector<16x1xf32>
    %240 = arith.divf %238, %239 : vector<16x1xf32>
    %241 = vector.broadcast %231 : vector<16x1xf32> to vector<16x32xf32>
    %242 = arith.subf %227, %241 : vector<16x32xf32>
    %cst_103 = arith.constant 9.99999974E-6 : f32
    %243 = vector.broadcast %cst_103 : f32 to vector<16x1xf32>
    %244 = arith.addf %240, %243 : vector<16x1xf32>
    %245 = math.rsqrt %244 : vector<16x1xf32>
    %246 = vector.broadcast %245 : vector<16x1xf32> to vector<16x32xf32>
    %247 = arith.mulf %242, %246 : vector<16x32xf32>
    %248 = vector.broadcast %6 : vector<1x32xf32> to vector<16x32xf32>
    %249 = arith.mulf %247, %248 : vector<16x32xf32>
    %250 = vector.broadcast %7 : vector<1x32xf32> to vector<16x32xf32>
    %251 = arith.addf %249, %250 : vector<16x32xf32>
    %c0_104 = arith.constant 0 : index
    %c0_105 = arith.constant 0 : index
    %252 = vector.load %arg21[%c0_104, %c0_105] : memref<32x64xf32, #tpu.memory_space<vmem>>, vector<32x64xf32>
    %cst_106 = arith.constant dense<0.000000e+00> : vector<16x64xf32>
    %253 = tpu.matmul %251, %252, %cst_106 {dimension_numbers = #tpu.dot_dimension_numbers<[1], [0], [0], [1], [0, 0, 1, 1], [], []>} : vector<16x32xf32>, vector<32x64xf32>, vector<16x64xf32> -> vector<16x64xf32>
    %c0_107 = arith.constant 0 : index
    %c0_108 = arith.constant 0 : index
    %254 = vector.load %arg22[%c0_107, %c0_108] : memref<1x64xf32, #tpu.memory_space<vmem>>, vector<1x64xf32>
    %255 = vector.broadcast %254 : vector<1x64xf32> to vector<16x64xf32>
    %256 = arith.addf %253, %255 : vector<16x64xf32>
    %cst_109 = arith.constant 0.000000e+00 : f32
    %257 = vector.broadcast %cst_109 : f32 to vector<16x64xf32>
    %258 = arith.maximumf %256, %257 : vector<16x64xf32>
    %c0_110 = arith.constant 0 : index
    %c0_111 = arith.constant 0 : index
    %259 = vector.load %arg23[%c0_110, %c0_111] : memref<64x32xf32, #tpu.memory_space<vmem>>, vector<64x32xf32>
    %cst_112 = arith.constant dense<0.000000e+00> : vector<16x32xf32>
    %260 = tpu.matmul %258, %259, %cst_112 {dimension_numbers = #tpu.dot_dimension_numbers<[1], [0], [0], [1], [0, 0, 1, 1], [], []>} : vector<16x64xf32>, vector<64x32xf32>, vector<16x32xf32> -> vector<16x32xf32>
    %c0_113 = arith.constant 0 : index
    %c0_114 = arith.constant 0 : index
    %261 = vector.load %arg24[%c0_113, %c0_114] : memref<1x32xf32, #tpu.memory_space<vmem>>, vector<1x32xf32>
    %262 = vector.broadcast %261 : vector<1x32xf32> to vector<16x32xf32>
    %263 = arith.addf %260, %262 : vector<16x32xf32>
    %264 = arith.addf %251, %263 : vector<16x32xf32>
    %cst_115 = arith.constant dense<0.000000e+00> : vector<16xf32>
    %265 = vector.multi_reduction <add>, %264, %cst_115 [1] : vector<16x32xf32> to vector<16xf32>
    %266 = vector.shape_cast %265 : vector<16xf32> to vector<16x1xf32>
    %cst_116 = arith.constant 3.200000e+01 : f32
    %267 = vector.broadcast %cst_116 : f32 to vector<16x1xf32>
    %268 = arith.divf %266, %267 : vector<16x1xf32>
    %269 = vector.broadcast %268 : vector<16x1xf32> to vector<16x32xf32>
    %270 = arith.subf %264, %269 : vector<16x32xf32>
    %271 = vector.broadcast %268 : vector<16x1xf32> to vector<16x32xf32>
    %272 = arith.subf %264, %271 : vector<16x32xf32>
    %273 = arith.mulf %270, %272 : vector<16x32xf32>
    %cst_117 = arith.constant dense<0.000000e+00> : vector<16xf32>
    %274 = vector.multi_reduction <add>, %273, %cst_117 [1] : vector<16x32xf32> to vector<16xf32>
    %275 = vector.shape_cast %274 : vector<16xf32> to vector<16x1xf32>
    %cst_118 = arith.constant 3.200000e+01 : f32
    %276 = vector.broadcast %cst_118 : f32 to vector<16x1xf32>
    %277 = arith.divf %275, %276 : vector<16x1xf32>
    %278 = vector.broadcast %268 : vector<16x1xf32> to vector<16x32xf32>
    %279 = arith.subf %264, %278 : vector<16x32xf32>
    %cst_119 = arith.constant 9.99999974E-6 : f32
    %280 = vector.broadcast %cst_119 : f32 to vector<16x1xf32>
    %281 = arith.addf %277, %280 : vector<16x1xf32>
    %282 = math.rsqrt %281 : vector<16x1xf32>
    %283 = vector.broadcast %282 : vector<16x1xf32> to vector<16x32xf32>
    %284 = arith.mulf %279, %283 : vector<16x32xf32>
    %285 = vector.broadcast %6 : vector<1x32xf32> to vector<16x32xf32>
    %286 = arith.mulf %284, %285 : vector<16x32xf32>
    %287 = vector.broadcast %7 : vector<1x32xf32> to vector<16x32xf32>
    %288 = arith.addf %286, %287 : vector<16x32xf32>
    %289 = vector.shape_cast %288 : vector<16x32xf32> to vector<2x8x32xf32>
    %c0_120 = arith.constant 0 : index
    %c0_121 = arith.constant 0 : index
    %c0_122 = arith.constant 0 : index
    %290 = vector.load %arg27[%c0_120, %c0_121, %c0_122] : memref<2x8x32xf32, #tpu.memory_space<vmem>>, vector<2x8x32xf32>
    tpu.vector_store %arg27[%c0_120, %c0_121, %c0_122], %289 {strides = array<i32>} : memref<2x8x32xf32, #tpu.memory_space<vmem>>, vector<2x8x32xf32>,
    return
  }
  func.func @transform_0(%arg0: i32) -> (i32, i32, i32) {
    %c0_i32 = arith.constant 0 : i32
    %c0_i32_0 = arith.constant 0 : i32
    %c0_i32_1 = arith.constant 0 : i32
    return %arg0, %c0_i32, %c0_i32_0 : i32, i32, i32
  }
  func.func @transform_1(%arg0: i32) -> (i32, i32, i32) {
    %c0_i32 = arith.constant 0 : i32
    %c0_i32_0 = arith.constant 0 : i32
    %c0_i32_1 = arith.constant 0 : i32
    return %arg0, %c0_i32, %c0_i32_0 : i32, i32, i32
  }
  func.func @transform_2(%arg0: i32) -> (i32, i32, i32) {
    %c0_i32 = arith.constant 0 : i32
    %c0_i32_0 = arith.constant 0 : i32
    %c0_i32_1 = arith.constant 0 : i32
    return %arg0, %c0_i32, %c0_i32_0 : i32, i32, i32
  }
  func.func @transform_3(%arg0: i32) -> (i32, i32, i32) {
    %c0_i32 = arith.constant 0 : i32
    %c0_i32_0 = arith.constant 0 : i32
    %c0_i32_1 = arith.constant 0 : i32
    return %arg0, %c0_i32, %c0_i32_0 : i32, i32, i32
  }
  func.func @transform_4(%arg0: i32) -> (i32, i32) {
    %c0_i32 = arith.constant 0 : i32
    %c0_i32_0 = arith.constant 0 : i32
    %c0_i32_1 = arith.constant 0 : i32
    return %c0_i32, %c0_i32_0 : i32, i32
  }
  func.func @transform_5(%arg0: i32) -> (i32, i32) {
    %c0_i32 = arith.constant 0 : i32
    %c0_i32_0 = arith.constant 0 : i32
    %c0_i32_1 = arith.constant 0 : i32
    return %c0_i32, %c0_i32_0 : i32, i32
  }
  func.func @transform_6(%arg0: i32) -> (i32, i32) {
    %c0_i32 = arith.constant 0 : i32
    %c0_i32_0 = arith.constant 0 : i32
    %c0_i32_1 = arith.constant 0 : i32
    return %c0_i32, %c0_i32_0 : i32, i32
  }
  func.func @transform_7(%arg0: i32) -> (i32, i32) {
    %c0_i32 = arith.constant 0 : i32
    %c0_i32_0 = arith.constant 0 : i32
    %c0_i32_1 = arith.constant 0 : i32
    return %c0_i32, %c0_i32_0 : i32, i32
  }
  func.func @transform_8(%arg0: i32) -> (i32, i32) {
    %c0_i32 = arith.constant 0 : i32
    %c0_i32_0 = arith.constant 0 : i32
    %c0_i32_1 = arith.constant 0 : i32
    return %c0_i32, %c0_i32_0 : i32, i32
  }
  func.func @transform_9(%arg0: i32) -> (i32, i32) {
    %c0_i32 = arith.constant 0 : i32
    %c0_i32_0 = arith.constant 0 : i32
    %c0_i32_1 = arith.constant 0 : i32
    return %c0_i32, %c0_i32_0 : i32, i32
  }
  func.func @transform_10(%arg0: i32) -> (i32, i32) {
    %c0_i32 = arith.constant 0 : i32
    %c0_i32_0 = arith.constant 0 : i32
    %c0_i32_1 = arith.constant 0 : i32
    return %c0_i32, %c0_i32_0 : i32, i32
  }
  func.func @transform_11(%arg0: i32) -> (i32, i32) {
    %c0_i32 = arith.constant 0 : i32
    %c0_i32_0 = arith.constant 0 : i32
    %c0_i32_1 = arith.constant 0 : i32
    return %c0_i32, %c0_i32_0 : i32, i32
  }
  func.func @transform_12(%arg0: i32) -> (i32, i32) {
    %c0_i32 = arith.constant 0 : i32
    %c0_i32_0 = arith.constant 0 : i32
    %c0_i32_1 = arith.constant 0 : i32
    return %c0_i32, %c0_i32_0 : i32, i32
  }
  func.func @transform_13(%arg0: i32) -> (i32, i32) {
    %c0_i32 = arith.constant 0 : i32
    %c0_i32_0 = arith.constant 0 : i32
    %c0_i32_1 = arith.constant 0 : i32
    return %c0_i32, %c0_i32_0 : i32, i32
  }
  func.func @transform_14(%arg0: i32) -> (i32, i32) {
    %c0_i32 = arith.constant 0 : i32
    %c0_i32_0 = arith.constant 0 : i32
    %c0_i32_1 = arith.constant 0 : i32
    return %c0_i32, %c0_i32_0 : i32, i32
  }
  func.func @transform_15(%arg0: i32) -> (i32, i32) {
    %c0_i32 = arith.constant 0 : i32
    %c0_i32_0 = arith.constant 0 : i32
    %c0_i32_1 = arith.constant 0 : i32
    return %c0_i32, %c0_i32_0 : i32, i32
  }
  func.func @transform_16(%arg0: i32) -> (i32, i32) {
    %c0_i32 = arith.constant 0 : i32
    %c0_i32_0 = arith.constant 0 : i32
    %c0_i32_1 = arith.constant 0 : i32
    return %c0_i32, %c0_i32_0 : i32, i32
  }
  func.func @transform_17(%arg0: i32) -> (i32, i32) {
    %c0_i32 = arith.constant 0 : i32
    %c0_i32_0 = arith.constant 0 : i32
    %c0_i32_1 = arith.constant 0 : i32
    return %c0_i32, %c0_i32_0 : i32, i32
  }
  func.func @transform_18(%arg0: i32) -> (i32, i32) {
    %c0_i32 = arith.constant 0 : i32
    %c0_i32_0 = arith.constant 0 : i32
    %c0_i32_1 = arith.constant 0 : i32
    return %c0_i32, %c0_i32_0 : i32, i32
  }
  func.func @transform_19(%arg0: i32) -> (i32, i32) {
    %c0_i32 = arith.constant 0 : i32
    %c0_i32_0 = arith.constant 0 : i32
    %c0_i32_1 = arith.constant 0 : i32
    return %c0_i32, %c0_i32_0 : i32, i32
  }
  func.func @transform_20(%arg0: i32) -> (i32, i32) {
    %c0_i32 = arith.constant 0 : i32
    %c0_i32_0 = arith.constant 0 : i32
    %c0_i32_1 = arith.constant 0 : i32
    return %c0_i32, %c0_i32_0 : i32, i32
  }
  func.func @transform_21(%arg0: i32) -> (i32, i32) {
    %c0_i32 = arith.constant 0 : i32
    %c0_i32_0 = arith.constant 0 : i32
    %c0_i32_1 = arith.constant 0 : i32
    return %c0_i32, %c0_i32_0 : i32, i32
  }
  func.func @transform_22(%arg0: i32) -> (i32, i32) {
    %c0_i32 = arith.constant 0 : i32
    %c0_i32_0 = arith.constant 0 : i32
    %c0_i32_1 = arith.constant 0 : i32
    return %c0_i32, %c0_i32_0 : i32, i32
  }
  func.func @transform_23(%arg0: i32) -> (i32, i32) {
    %c0_i32 = arith.constant 0 : i32
    %c0_i32_0 = arith.constant 0 : i32
    %c0_i32_1 = arith.constant 0 : i32
    return %c0_i32, %c0_i32_0 : i32, i32
  }
  func.func @transform_24(%arg0: i32) -> (i32, i32) {
    %c0_i32 = arith.constant 0 : i32
    %c0_i32_0 = arith.constant 0 : i32
    %c0_i32_1 = arith.constant 0 : i32
    return %c0_i32, %c0_i32_0 : i32, i32
  }
  func.func @transform_25(%arg0: i32) -> (i32, i32) {
    %c0_i32 = arith.constant 0 : i32
    %c0_i32_0 = arith.constant 0 : i32
    %c0_i32_1 = arith.constant 0 : i32
    return %c0_i32, %c0_i32_0 : i32, i32
  }
  func.func @transform_26(%arg0: i32) -> (i32, i32, i32) {
    %c0_i32 = arith.constant 0 : i32
    %c0_i32_0 = arith.constant 0 : i32
    %c0_i32_1 = arith.constant 0 : i32
    return %arg0, %c0_i32, %c0_i32_0 : i32, i32, i32
  }
}

</mosaic_0001>

<bundles_post_ra>
// kernel: tpu_custom_call.1
= control target key start
LH: loop header
LB: loop body
LE: loop exit
PB: predicated region body
PF: predicated region fallthrough
CT: control target
= control target key end

     0   :  { %s6311_s0 = inlined_call_operand.vmem [shape: f32[2,16,32], index: 0, kind: input, shape index: {}]   ;;  %s6312_s1 = inlined_call_operand.hbm [shape: f32[2,8,16], index: 1, kind: input, shape index: {}]   ;;  %s6313_s2 = inlined_call_operand.hbm [shape: f32[2,8,32], index: 2, kind: input, shape index: {}]   ;;  %s6314_s3 = inlined_call_operand.hbm [shape: f32[2,8,8], index: 3, kind: input, shape index: {}]   ;;  %s6315_s4 = inlined_call_operand.vmem [shape: f32[32,32], index: 4, kind: input, shape index: {}]   ;;  %s6316_s5 = inlined_call_operand.hbm [shape: f32[1,32], index: 5, kind: input, shape index: {}]   ;;  %s6317_s6 = inlined_call_operand.vmem [shape: f32[32,32], index: 6, kind: input, shape index: {}]   ;;  %s6318_s7 = inlined_call_operand.hbm [shape: f32[1,32], index: 7, kind: input, shape index: {}]   ;;  %s6319_s8 = inlined_call_operand.hbm [shape: f32[32,32], index: 8, kind: input, shape index: {}]   ;;  %s6320_s9 = inlined_call_operand.hbm [shape: f32[1,32], index: 9, kind: input, shape index: {}]   ;;  %s6321_s10 = inlined_call_operand.vmem [shape: f32[32,32], index: 10, kind: input, shape index: {}]   ;;  %s6322_s11 = inlined_call_operand.hbm [shape: f32[1,32], index: 11, kind: input, shape index: {}]   ;;  %s6323_s12 = inlined_call_operand.hbm [shape: f32[32,32], index: 12, kind: input, shape index: {}]   ;;  %s6324_s13 = inlined_call_operand.hbm [shape: f32[1,32], index: 13, kind: input, shape index: {}]   ;;  %s6325_s14 = inlined_call_operand.hbm [shape: f32[32,32], index: 14, kind: input, shape index: {}]   ;;  %s6326_s15 = inlined_call_operand.hbm [shape: f32[1,32], index: 15, kind: input, shape index: {}]   ;;  %s6327_s16 = inlined_call_operand.hbm [shape: f32[32,32], index: 16, kind: input, shape index: {}]   ;;  %s6328_s17 = inlined_call_operand.hbm [shape: f32[1,32], index: 17, kind: input, shape index: {}]   ;;  %s6329_s18 = inlined_call_operand.vmem [shape: f32[32,32], index: 18, kind: input, shape index: {}]   ;;  %s6330_s19 = inlined_call_operand.vmem [shape: f32[1,32], index: 19, kind: input, shape index: {}]   ;;  %s6331_s20 = inlined_call_operand.hbm [shape: f32[32,64], index: 20, kind: input, shape index: {}]   ;;  %s6332_s21 = inlined_call_operand.vmem [shape: f32[1,64], index: 21, kind: input, shape index: {}]   ;;  %s6333_s22 = inlined_call_operand.vmem [shape: f32[64,32], index: 22, kind: input, shape index: {}]   ;;  %s6334_s23 = inlined_call_operand.vmem [shape: f32[1,32], index: 23, kind: input, shape index: {}]   ;;  %s6335_s24 = inlined_call_operand.vmem [shape: f32[1,32], index: 24, kind: input, shape index: {}]   ;;  %s6336_s25 = inlined_call_operand.vmem [shape: f32[1,32], index: 25, kind: input, shape index: {}]   ;;  %s6337_s26 = inlined_call_operand.hbm [shape: f32[2,8,32], index: 26, kind: output, shape index: {}]  }
   0x1   :  { %6354 = sst [smem:[#allocation36_spill]] %s6311_s0 }
   0x2   :  { %6355 = sst [smem:[#allocation37_spill]] %s6312_s1 }
   0x3   :  { %6356 = sst [smem:[#allocation38_spill]] %s6313_s2 }
   0x4   :  { %6357 = sst [smem:[#allocation39_spill]] %s6314_s3 }
   0x5   :  { %6358 = sst [smem:[#allocation40_spill]] %s6315_s4 }
   0x6   :  { %6359 = sst [smem:[#allocation41_spill]] %s6316_s5 }
   0x7   :  { %6360 = sst [smem:[#allocation42_spill]] %s6317_s6 }
   0x8   :  { %6361 = sst [smem:[#allocation43_spill]] %s6318_s7 }
   0x9   :  { %6362 = sst [smem:[#allocation44_spill]] %s6319_s8 }
   0xa   :  { %6363 = sst [smem:[#allocation45_spill]] %s6320_s9 }
   0xb   :  { %6364 = sst [smem:[#allocation46_spill]] %s6321_s10 }
   0xc   :  { %6365 = sst [smem:[#allocation47_spill]] %s6337_s26 }
   0xd   :  { %31 = vsyncpa [#allocation3], 0 }
   0xe   :  { %32 = vsyncpa [#allocation6], 0 }
   0xf   :  { %33 = vsyncpa [#allocation9], 0 }
  0x10   :  { %34 = vsyncpa [#allocation12], 0 }
  0x11   :  { %35 = vsyncpa [#allocation15], 0 }
  0x12   :  { %36 = vsyncpa [#allocation18], 0 }
  0x13   :  { %37 = vsyncpa [#allocation21], 0 }
  0x14   :  { %38 = vsyncpa [#allocation24], 0 }
  0x15   :  { %39 = vsyncpa [#allocation4], 0  ;;  %s5357_s27 = smov [#allocation5]   ;;  %s5358_s7 = smov [#allocation8]  }
  0x16   :  { %s59_s3 = sshll.u32 %s5357_s27, 4  ;;  %s86_s28 = sshll.u32 %s5358_s7, 4  ;;  %s60_s3 = int_to_ptr.vmem [resolvable:$true] %s59_s3  ;;  %s5518_s28 = int_to_ptr.vmem [resolvable:$true] %s86_s28 }
  0x17   :  { %s6366_s29 = sld [smem:[#allocation38_spill]] }
  0x1d   :  { %s4987_s0 = scalar_lea.hbm %s6366_s29, 256 }
  0x1e   :  { %p4988_p0 = scmp.ne.s32.totalorder %s6366_s29, %s4987_s0  ;;  %p4991_p1 = scmp.lt.u32.totalorder %s4987_s0, %s6366_s29 }
  0x20   :  { %p4993_p2 = pnand %p4991_p1, %p4988_p0 }
  0x22   :  { %4996 = shalt.err (!%p4993_p2)
}
  0x23   :  { %s4997_s10 = scalar_lea.vmem %s60_s3, 256  ;;  %p5002_p4 = scmp.lt.s32.totalorder %s60_s3, %s60_s3 }
  0x24   :  { %p4998_p3 = scmp.ne.s32.totalorder %s60_s3, %s4997_s10  ;;  %p5003_p5 = scmp.lt.s32.totalorder %s4997_s10, %s4997_s10 }
  0x26   :  { %p5004_p6 = por %p5003_p5, %p5002_p4 }
  0x28   :  { %p5005_p7 = pnand %p5004_p6, %p4998_p3 }
  0x2a   :  { %5008 = shalt.err (!%p5005_p7)
}
  0x2b   :  { %s6349_s6 = smov 128   ;;  %s6351_s1 = smov 8  }
  0x2c   :  { %65 = dma.hbm_to_vmem [thread:$0]  %s6366_s29, 256, %s60_s3, [#allocation6], %s6349_s6, %s6349_s6, %s6351_s1  }
  0x2d   :  { %s6367_s0 = sld [smem:[#allocation41_spill]] }
  0x33   :  { %s5009_s9 = scalar_lea.hbm %s6367_s0, 16 }
  0x34   :  { %p5010_p8 = scmp.ne.s32.totalorder %s6367_s0, %s5009_s9  ;;  %p5013_p9 = scmp.lt.u32.totalorder %s5009_s9, %s6367_s0 }
  0x36   :  { %p5015_p10 = pnand %p5013_p9, %p5010_p8 }
  0x38   :  { %5018 = shalt.err (!%p5015_p10)
}
  0x39   :  { %s5019_s27 = scalar_lea.vmem %s5518_s28, 16  ;;  %s5023_s3 = scalar_lea.vmem %s5518_s28, 32 }
  0x3a   :  { %p5020_p11 = scmp.ne.s32.totalorder %s5518_s28, %s5019_s27  ;;  %p5024_p12 = scmp.lt.s32.totalorder %s5518_s28, %s5518_s28 }
  0x3b   :  { %p5025_p13 = scmp.lt.s32.totalorder %s5023_s3, %s5019_s27 }
  0x3d   :  { %p5026_p0 = por %p5025_p13, %p5024_p12 }
  0x3f   :  { %p5027_p1 = pnand %p5026_p0, %p5020_p11 }
  0x41   :  { %5030 = shalt.err (!%p5027_p1)
}
  0x42   :  { %89 = dma.hbm_to_vmem [thread:$0]  %s6367_s0, 16, %s5518_s28, [#allocation9]  }
  0x43   :  { %s5361_s8 = smov [#allocation11]   ;;  %s5362_s9 = smov [#allocation14]  }
  0x44   :  { %s107_s4 = sshll.u32 %s5361_s8, 4  ;;  %s132_s30 = sshll.u32 %s5362_s9, 4  ;;  %s108_s4 = int_to_ptr.vmem [resolvable:$true] %s107_s4  ;;  %s133_s30 = int_to_ptr.vmem [resolvable:$true] %s132_s30 }
  0x45   :  { %s6368_s10 = sld [smem:[#allocation44_spill]] }
  0x4b   :  { %s5031_s6 = scalar_lea.hbm %s6368_s10, 512 }
  0x4c   :  { %p5032_p2 = scmp.ne.s32.totalorder %s6368_s10, %s5031_s6  ;;  %p5035_p3 = scmp.lt.u32.totalorder %s5031_s6, %s6368_s10 }
  0x4e   :  { %p5037_p4 = pnand %p5035_p3, %p5032_p2 }
  0x50   :  { %5040 = shalt.err (!%p5037_p4)
}
  0x51   :  { %s5041_s28 = scalar_lea.vmem %s108_s4, 512  ;;  %p5046_p6 = scmp.lt.s32.totalorder %s108_s4, %s108_s4 }
  0x52   :  { %p5042_p5 = scmp.ne.s32.totalorder %s108_s4, %s5041_s28  ;;  %p5047_p7 = scmp.lt.s32.totalorder %s5041_s28, %s5041_s28 }
  0x54   :  { %p5048_p8 = por %p5047_p7, %p5046_p6 }
  0x56   :  { %p5049_p9 = pnand %p5048_p8, %p5042_p5 }
  0x58   :  { %5052 = shalt.err (!%p5049_p9)
}
  0x59   :  { %s6369_s0 = smov 8   ;;  %s6370_s29 = smov 128  }
  0x5a   :  { %113 = dma.hbm_to_vmem [thread:$0]  %s6368_s10, 512, %s108_s4, [#allocation12], %s6370_s29, %s6370_s29, %s6369_s0  }
  0x5b   :  { %s5053_s26 = scalar_lea.hbm %s6322_s11, 16 }
  0x5c   :  { %p5054_p10 = scmp.ne.s32.totalorder %s6322_s11, %s5053_s26  ;;  %p5057_p11 = scmp.lt.u32.totalorder %s5053_s26, %s6322_s11 }
  0x5e   :  { %p5059_p12 = pnand %p5057_p11, %p5054_p10 }
  0x60   :  { %5062 = shalt.err (!%p5059_p12)
}
  0x61   :  { %s5063_s3 = scalar_lea.vmem %s133_s30, 16  ;;  %s5067_s28 = scalar_lea.vmem %s133_s30, 32 }
  0x62   :  { %p5064_p13 = scmp.ne.s32.totalorder %s133_s30, %s5063_s3  ;;  %p5068_p0 = scmp.lt.s32.totalorder %s133_s30, %s133_s30 }
  0x63   :  { %p5069_p1 = scmp.lt.s32.totalorder %s5067_s28, %s5063_s3 }
  0x65   :  { %p5070_p2 = por %p5069_p1, %p5068_p0 }
  0x67   :  { %p5071_p3 = pnand %p5070_p2, %p5064_p13 }
  0x69   :  { %5074 = shalt.err (!%p5071_p3)
}
  0x6a   :  { %135 = dma.hbm_to_vmem [thread:$0]  %s6322_s11, 16, %s133_s30, [#allocation15]  }
  0x6b   :  { %s5363_s7 = smov [#allocation17]   ;;  %s5364_s1 = smov [#allocation20]  }
  0x6c   :  { %s154_s8 = sshll.u32 %s5363_s7, 4  ;;  %s176_s9 = sshll.u32 %s5364_s1, 4  ;;  %s155_s8 = int_to_ptr.vmem [resolvable:$true] %s154_s8  ;;  %s177_s9 = int_to_ptr.vmem [resolvable:$true] %s176_s9 }
  0x6d   :  { %s5075_s2 = scalar_lea.hbm %s6324_s13, 16 }
  0x6e   :  { %p5076_p4 = scmp.ne.s32.totalorder %s6324_s13, %s5075_s2  ;;  %p5079_p5 = scmp.lt.u32.totalorder %s5075_s2, %s6324_s13 }
  0x70   :  { %p5081_p6 = pnand %p5079_p5, %p5076_p4 }
  0x72   :  { %5084 = shalt.err (!%p5081_p6)
}
  0x73   :  { %s5085_s11 = scalar_lea.vmem %s155_s8, 16  ;;  %s5089_s30 = scalar_lea.vmem %s155_s8, 32 }
  0x74   :  { %p5086_p7 = scmp.ne.s32.totalorder %s155_s8, %s5085_s11  ;;  %p5090_p8 = scmp.lt.s32.totalorder %s155_s8, %s155_s8 }
  0x75   :  { %p5091_p9 = scmp.lt.s32.totalorder %s5089_s30, %s5085_s11 }
  0x77   :  { %p5092_p10 = por %p5091_p9, %p5090_p8 }
  0x79   :  { %p5093_p11 = pnand %p5092_p10, %p5086_p7 }
  0x7b   :  { %5096 = shalt.err (!%p5093_p11)
}
  0x7c   :  { %157 = dma.hbm_to_vmem [thread:$0]  %s6324_s13, 16, %s155_s8, [#allocation18]  }
  0x7d   :  { %s5097_s26 = scalar_lea.hbm %s6326_s15, 16 }
  0x7e   :  { %p5098_p12 = scmp.ne.s32.totalorder %s6326_s15, %s5097_s26  ;;  %p5101_p13 = scmp.lt.u32.totalorder %s5097_s26, %s6326_s15 }
  0x80   :  { %p5103_p0 = pnand %p5101_p13, %p5098_p12 }
  0x82   :  { %5106 = shalt.err (!%p5103_p0)
}
  0x83   :  { %s5107_s3 = scalar_lea.vmem %s177_s9, 16  ;;  %s5111_s28 = scalar_lea.vmem %s177_s9, 32 }
  0x84   :  { %p5108_p1 = scmp.ne.s32.totalorder %s177_s9, %s5107_s3  ;;  %p5112_p2 = scmp.lt.s32.totalorder %s177_s9, %s177_s9 }
  0x85   :  { %p5113_p3 = scmp.lt.s32.totalorder %s5111_s28, %s5107_s3 }
  0x87   :  { %p5114_p4 = por %p5113_p3, %p5112_p2 }
  0x89   :  { %p5115_p5 = pnand %p5114_p4, %p5108_p1 }
  0x8b   :  { %5118 = shalt.err (!%p5115_p5)
}
  0x8c   :  { %179 = dma.hbm_to_vmem [thread:$0]  %s6326_s15, 16, %s177_s9, [#allocation21]  }
  0x8d   :  { %s5365_s11 = smov [#allocation23]   ;;  %s5366_s4 = smov [#allocation2]  }
  0x8e   :  { %s198_s30 = sshll.u32 %s5365_s11, 4  ;;  %s47_s10 = sshll.u32 %s5366_s4, 4  ;;  %s199_s30 = int_to_ptr.vmem [resolvable:$true] %s198_s30  ;;  %s5604_s10 = int_to_ptr.vmem [resolvable:$true] %s47_s10 }
  0x8f   :  { %s5119_s26 = scalar_lea.hbm %s6328_s17, 16 }
  0x90   :  { %p5120_p6 = scmp.ne.s32.totalorder %s6328_s17, %s5119_s26  ;;  %p5123_p7 = scmp.lt.u32.totalorder %s5119_s26, %s6328_s17 }
  0x92   :  { %p5125_p8 = pnand %p5123_p7, %p5120_p6 }
  0x94   :  { %5128 = shalt.err (!%p5125_p8)
}
  0x95   :  { %s5129_s15 = scalar_lea.vmem %s199_s30, 16  ;;  %s5133_s9 = scalar_lea.vmem %s199_s30, 32 }
  0x96   :  { %p5130_p9 = scmp.ne.s32.totalorder %s199_s30, %s5129_s15  ;;  %p5134_p10 = scmp.lt.s32.totalorder %s199_s30, %s199_s30 }
  0x97   :  { %p5135_p11 = scmp.lt.s32.totalorder %s5133_s9, %s5129_s15 }
  0x99   :  { %p5136_p12 = por %p5135_p11, %p5134_p10 }
  0x9b   :  { %p5137_p13 = pnand %p5136_p12, %p5130_p9 }
  0x9d   :  { %5140 = shalt.err (!%p5137_p13)
}
  0x9e   :  { %201 = dma.hbm_to_vmem [thread:$0]  %s6328_s17, 16, %s199_s30, [#allocation24]  }
  0x9f   :  { %s6371_s11 = sld [smem:[#allocation37_spill]] }
  0xa5   :  { %s5141_s4 = scalar_lea.hbm %s6371_s11, 256 }
  0xa6   :  { %p5142_p0 = scmp.ne.s32.totalorder %s6371_s11, %s5141_s4  ;;  %p5145_p1 = scmp.lt.u32.totalorder %s5141_s4, %s6371_s11 }
  0xa8   :  { %p5147_p2 = pnand %p5145_p1, %p5142_p0 }
  0xaa   :  { %5150 = shalt.err (!%p5147_p2)
}
  0xab   :  { %s5151_s2 = scalar_lea.vmem %s5604_s10, 256  ;;  %p5156_p4 = scmp.lt.s32.totalorder %s5604_s10, %s5604_s10 }
  0xac   :  { %p5152_p3 = scmp.ne.s32.totalorder %s5604_s10, %s5151_s2  ;;  %p5157_p5 = scmp.lt.s32.totalorder %s5151_s2, %s5151_s2 }
  0xae   :  { %p5158_p6 = por %p5157_p5, %p5156_p4 }
  0xb0   :  { %p5159_p7 = pnand %p5158_p6, %p5152_p3 }
  0xb2   :  { %5162 = shalt.err (!%p5159_p7)
}
  0xb3   :  { %53 = dma.hbm_to_vmem [thread:$0]  %s6371_s11, 256, %s5604_s10, [#allocation3], %s6370_s29, %s6370_s29, %s6369_s0  }
  0xb4   :  { %s5367_s5 = smov [#allocation7]   ;;  %s5368_s15 = smov [#allocation10]  }
  0xb5   :  { %s71_s27 = sshll.u32 %s5367_s5, 4  ;;  %s98_s9 = sshll.u32 %s5368_s15, 4  ;;  %s72_s27 = int_to_ptr.vmem [resolvable:$true] %s71_s27  ;;  %s99_s9 = int_to_ptr.vmem [resolvable:$true] %s98_s9 }
  0xb6   :  { %s6372_s13 = sld [smem:[#allocation39_spill]] }
  0xbc   :  { %s5163_s8 = scalar_lea.hbm %s6372_s13, 256 }
  0xbd   :  { %p5164_p8 = scmp.ne.s32.totalorder %s6372_s13, %s5163_s8  ;;  %p5167_p9 = scmp.lt.u32.totalorder %s5163_s8, %s6372_s13 }
  0xbf   :  { %p5169_p10 = pnand %p5167_p9, %p5164_p8 }
  0xc1   :  { %5172 = shalt.err (!%p5169_p10)
}
  0xc2   :  { %s5173_s10 = scalar_lea.vmem %s72_s27, 256  ;;  %p5178_p12 = scmp.lt.s32.totalorder %s72_s27, %s72_s27 }
  0xc3   :  { %p5174_p11 = scmp.ne.s32.totalorder %s72_s27, %s5173_s10  ;;  %p5179_p13 = scmp.lt.s32.totalorder %s5173_s10, %s5173_s10 }
  0xc5   :  { %p5180_p0 = por %p5179_p13, %p5178_p12 }
  0xc7   :  { %p5181_p1 = pnand %p5180_p0, %p5174_p11 }
  0xc9   :  { %5184 = shalt.err (!%p5181_p1)
}
  0xca   :  { %77 = dma.hbm_to_vmem [thread:$0]  %s6372_s13, 256, %s72_s27, [#allocation6], %s6370_s29, %s6370_s29, %s6369_s0  }
  0xcb   :  { %s6373_s30 = sld [smem:[#allocation43_spill]] }
  0xd1   :  { %s5185_s5 = scalar_lea.hbm %s6373_s30, 16 }
  0xd2   :  { %p5186_p2 = scmp.ne.s32.totalorder %s6373_s30, %s5185_s5  ;;  %p5189_p3 = scmp.lt.u32.totalorder %s5185_s5, %s6373_s30 }
  0xd4   :  { %p5191_p4 = pnand %p5189_p3, %p5186_p2 }
  0xd6   :  { %5194 = shalt.err (!%p5191_p4)
}
  0xd7   :  { %s5195_s4 = scalar_lea.vmem %s99_s9, 16  ;;  %s5199_s7 = scalar_lea.vmem %s99_s9, 32 }
  0xd8   :  { %p5196_p5 = scmp.ne.s32.totalorder %s99_s9, %s5195_s4  ;;  %p5200_p6 = scmp.lt.s32.totalorder %s99_s9, %s99_s9 }
  0xd9   :  { %p5201_p7 = scmp.lt.s32.totalorder %s5199_s7, %s5195_s4 }
  0xdb   :  { %p5202_p8 = por %p5201_p7, %p5200_p6 }
  0xdd   :  { %p5203_p9 = pnand %p5202_p8, %p5196_p5 }
  0xdf   :  { %5206 = shalt.err (!%p5203_p9)
}
  0xe0   :  { %101 = dma.hbm_to_vmem [thread:$0]  %s6373_s30, 16, %s99_s9, [#allocation9]  }
  0xe1   :  { %s5369_s1 = smov [#allocation13]   ;;  %s5370_s10 = smov [#allocation16]  }
  0xe2   :  { %s120_s26 = sshll.u32 %s5369_s1, 4  ;;  %s141_s11 = sshll.u32 %s5370_s10, 4  ;;  %s121_s26 = int_to_ptr.vmem [resolvable:$true] %s120_s26  ;;  %s5665_s11 = int_to_ptr.vmem [resolvable:$true] %s141_s11 }
  0xe3   :  { %s6374_s17 = sld [smem:[#allocation45_spill]] }
  0xe9   :  { %s5207_s5 = scalar_lea.hbm %s6374_s17, 16 }
  0xea   :  { %p5208_p10 = scmp.ne.s32.totalorder %s6374_s17, %s5207_s5  ;;  %p5211_p11 = scmp.lt.u32.totalorder %s5207_s5, %s6374_s17 }
  0xec   :  { %p5213_p12 = pnand %p5211_p11, %p5208_p10 }
  0xee   :  { %5216 = shalt.err (!%p5213_p12)
}
  0xef   :  { %s5217_s9 = scalar_lea.vmem %s121_s26, 16  ;;  %s5221_s30 = scalar_lea.vmem %s121_s26, 32 }
  0xf0   :  { %p5218_p13 = scmp.ne.s32.totalorder %s121_s26, %s5217_s9  ;;  %p5222_p0 = scmp.lt.s32.totalorder %s121_s26, %s121_s26 }
  0xf1   :  { %p5223_p1 = scmp.lt.s32.totalorder %s5221_s30, %s5217_s9 }
  0xf3   :  { %p5224_p2 = por %p5223_p1, %p5222_p0 }
  0xf5   :  { %p5225_p3 = pnand %p5224_p2, %p5218_p13 }
  0xf7   :  { %5228 = shalt.err (!%p5225_p3)
}
  0xf8   :  { %123 = dma.hbm_to_vmem [thread:$0]  %s6374_s17, 16, %s121_s26, [#allocation12]  }
  0xf9   :  { %s5229_s1 = scalar_lea.hbm %s6323_s12, 512 }
  0xfa   :  { %p5230_p4 = scmp.ne.s32.totalorder %s6323_s12, %s5229_s1  ;;  %p5233_p5 = scmp.lt.u32.totalorder %s5229_s1, %s6323_s12 }
  0xfc   :  { %p5235_p6 = pnand %p5233_p5, %p5230_p4 }
  0xfe   :  { %5238 = shalt.err (!%p5235_p6)
}
  0xff   :  { %s5239_s15 = scalar_lea.vmem %s5665_s11, 512  ;;  %p5244_p8 = scmp.lt.s32.totalorder %s5665_s11, %s5665_s11 }
 0x100   :  { %p5240_p7 = scmp.ne.s32.totalorder %s5665_s11, %s5239_s15  ;;  %p5245_p9 = scmp.lt.s32.totalorder %s5239_s15, %s5239_s15 }
 0x102   :  { %p5246_p10 = por %p5245_p9, %p5244_p8 }
 0x104   :  { %p5247_p11 = pnand %p5246_p10, %p5240_p7 }
 0x106   :  { %5250 = shalt.err (!%p5247_p11)
}
 0x107   :  { %147 = dma.hbm_to_vmem [thread:$0]  %s6323_s12, 512, %s5665_s11, [#allocation15], %s6370_s29, %s6370_s29, %s6369_s0  }
 0x108   :  { %s5371_s3 = smov [#allocation19]   ;;  %s5372_s8 = smov [#allocation22]  }
 0x109   :  { %s163_s28 = sshll.u32 %s5371_s3, 4  ;;  %s185_s9 = sshll.u32 %s5372_s8, 4  ;;  %s164_s28 = int_to_ptr.vmem [resolvable:$true] %s163_s28  ;;  %s5699_s9 = int_to_ptr.vmem [resolvable:$true] %s185_s9 }
 0x10a   :  { %s5251_s7 = scalar_lea.hbm %s6325_s14, 512 }
 0x10b   :  { %p5252_p12 = scmp.ne.s32.totalorder %s6325_s14, %s5251_s7  ;;  %p5255_p13 = scmp.lt.u32.totalorder %s5251_s7, %s6325_s14 }
 0x10d   :  { %p5257_p0 = pnand %p5255_p13, %p5252_p12 }
 0x10f   :  { %5260 = shalt.err (!%p5257_p0)
}
 0x110   :  { %s5261_s12 = scalar_lea.vmem %s164_s28, 512  ;;  %p5266_p2 = scmp.lt.s32.totalorder %s164_s28, %s164_s28 }
 0x111   :  { %p5262_p1 = scmp.ne.s32.totalorder %s164_s28, %s5261_s12  ;;  %p5267_p3 = scmp.lt.s32.totalorder %s5261_s12, %s5261_s12 }
 0x113   :  { %p5268_p4 = por %p5267_p3, %p5266_p2 }
 0x115   :  { %p5269_p5 = pnand %p5268_p4, %p5262_p1 }
 0x117   :  { %5272 = shalt.err (!%p5269_p5)
}
 0x118   :  { %169 = dma.hbm_to_vmem [thread:$0]  %s6325_s14, 512, %s164_s28, [#allocation18], %s6370_s29, %s6370_s29, %s6369_s0  }
 0x119   :  { %s5273_s15 = scalar_lea.hbm %s6327_s16, 512 }
 0x11a   :  { %p5274_p6 = scmp.ne.s32.totalorder %s6327_s16, %s5273_s15  ;;  %p5277_p7 = scmp.lt.u32.totalorder %s5273_s15, %s6327_s16 }
 0x11c   :  { %p5279_p8 = pnand %p5277_p7, %p5274_p6 }
 0x11e   :  { %5282 = shalt.err (!%p5279_p8)
}
 0x11f   :  { %s5283_s30 = scalar_lea.vmem %s5699_s9, 512  ;;  %p5288_p10 = scmp.lt.s32.totalorder %s5699_s9, %s5699_s9 }
 0x120   :  { %p5284_p9 = scmp.ne.s32.totalorder %s5699_s9, %s5283_s30  ;;  %p5289_p11 = scmp.lt.s32.totalorder %s5283_s30, %s5283_s30 }
 0x122   :  { %p5290_p12 = por %p5289_p11, %p5288_p10 }
 0x124   :  { %p5291_p13 = pnand %p5290_p12, %p5284_p9 }
 0x126   :  { %5294 = shalt.err (!%p5291_p13)
}
 0x127   :  { %191 = dma.hbm_to_vmem [thread:$0]  %s6327_s16, 512, %s5699_s9, [#allocation21], %s6370_s29, %s6370_s29, %s6369_s0  }
 0x128   :  { %s5373_s4 = smov [#allocation25]   ;;  %s5295_s1 = scalar_lea.hbm %s6331_s20, 512 }
 0x129   :  { %s211_s7 = sshll.u32 %s5373_s4, 4  ;;  %p5296_p0 = scmp.ne.s32.totalorder %s6331_s20, %s5295_s1  ;;  %s212_s7 = int_to_ptr.vmem [resolvable:$true] %s211_s7 }
 0x12a   :  { %p5299_p1 = scmp.lt.u32.totalorder %s5295_s1, %s6331_s20 }
 0x12c   :  { %p5301_p2 = pnand %p5299_p1, %p5296_p0 }
 0x12e   :  { %5304 = shalt.err (!%p5301_p2)
}
 0x12f   :  { %s5305_s2 = scalar_lea.vmem %s212_s7, 512  ;;  %p5310_p4 = scmp.lt.s32.totalorder %s212_s7, %s212_s7 }
 0x130   :  { %p5306_p3 = scmp.ne.s32.totalorder %s212_s7, %s5305_s2  ;;  %p5311_p5 = scmp.lt.s32.totalorder %s5305_s2, %s5305_s2 }
 0x132   :  { %p5312_p6 = por %p5311_p5, %p5310_p4 }
 0x134   :  { %p5313_p7 = pnand %p5312_p6, %p5306_p3 }
 0x136   :  { %5316 = shalt.err (!%p5313_p7)
}
 0x137   :  { %217 = dma.hbm_to_vmem [thread:$0]  %s6331_s20, 512, %s212_s7, [#allocation24], %s6370_s29, %s6370_s29, %s6369_s0  }
 0x138   :  { %5339 = dma.done.wait [#allocation3], 256  }
 0x139   :  { %5340 = vsyncadd [#allocation3], 4294967040 }
 0x13a   :  { %5341 = dma.done.wait [#allocation6], 512  }
 0x13b   :  { %5342 = vsyncadd [#allocation6], 4294966784 }
 0x13c   :  { %5343 = dma.done.wait [#allocation9], 32  }
 0x13d   :  { %5344 = vsyncadd [#allocation9], 4294967264 }
 0x13e   :  { %5345 = dma.done.wait [#allocation12], 528  }
 0x13f   :  { %5346 = vsyncadd [#allocation12], 4294966768 }
 0x140   :  { %5347 = dma.done.wait [#allocation15], 528  }
 0x141   :  { %5348 = vsyncadd [#allocation15], 4294966768 }
 0x142   :  { %5349 = dma.done.wait [#allocation18], 528  }
 0x143   :  { %5350 = vsyncadd [#allocation18], 4294966768 }
 0x144   :  { %5351 = dma.done.wait [#allocation21], 528  }
 0x145   :  { %5352 = vsyncadd [#allocation21], 4294966768 }
 0x146   :  { %5353 = dma.done.wait [#allocation24], 528  }
 0x147   :  { %5354 = vsyncadd [#allocation24], 4294966768  ;;  %vm296_vm0 = vcmask 261120   ;;  %s6375_s20 = sld [smem:[#allocation40_spill]]  ;;  %v5763_v5 = vld [vmem:[#allocation5] sm:$0xff]  ;;  %s6376_s7 = sld [smem:[#allocation42_spill]] }
 0x148   :  { %4373 = vmatprep.mubr.msk.f32.mxu1 %vm296_vm0, %v5763_v5  ;;  %4395 = vmatprep.mubr.msk.f32.mxu0 %vm296_vm0, %v5763_v5  ;;  %v5781_v12 = vld [vmem:[#allocation5 + $0x8] sm:$0xff]  ;;  %v5374_v14 = vmov 0.0   ;;  %vm5375_vm1 = vmmov 0   ;;  %v4128_v17 = vld [vmem:[#allocation10] ss:$0 sm:$0xff]  ;;  %vm550_vm2 = vcmask 64512  }
 0x149   :  { %v4125_v21 = vld [vmem:[#allocation8] ss:$0 sm:$0xff]  ;;  %s5376_s6 = smov 120   ;;  %v464_v25 = vld [vmem:[#allocation11] sm:$0xff]  ;;  %v465_v26 = vld [vmem:[#allocation11 + $0x8] sm:$0xff]  ;;  %s5377_s2 = smov 112  }
 0x14a   :  { %v466_v27 = vld [vmem:[#allocation11 + $0x10] sm:$0xff]  ;;  %v4697_v28 = vpack.c.bf16 %v465_v26, %v464_v25  ;;  %v467_v29 = vld [vmem:[#allocation11 + $0x18] sm:$0xff]  ;;  %v4131_v54 = vld [vmem:[#allocation13] ss:$0 sm:$0xff]  ;;  %s5378_s16 = smov 104   ;;  %s5379_s9 = smov 16  }
 0x14b   :  { %v4701_v30 = vpack.c.bf16 %v467_v29, %v466_v27  ;;  %v5823_v32 = vld [vmem:[#allocation7] sm:$0xff]  ;;  %v5826_v37 = vld [vmem:[#allocation7 + $0x8] sm:$0xff]  ;;  %s5380_s28 = smov 24   ;;  %vm1908_vm3 = vcmask 195584   ;;  %vm1905_vm4 = vcmask 130048   ;;  %s6378_s27 = sld [smem:[#allocation36_spill]]  ;;  %vm6039_vm5 = vmpackc.low %vm550_vm2, %vm550_vm2 }
 0x14c   :  { %4698 = vmatprep.subr.bf16.mxu0 %v4697_v28  ;;  %vm3985_vm6 = vcmask 523264  }
 0x14d   :  { %v285_v0 = vld [vmem:[%s6375_s20] sm:$0xff]  ;;  %v286_v1 = vld [vmem:[%s6375_s20 + $0x8] sm:$0xff]  ;;  %v287_v2 = vld [vmem:[%s6375_s20 + $0x10] sm:$0xff]  ;;  %4700 = vmatpush3.bf16.msra.mxu0 %v4697_v28 }
 0x14e   :  { %v4681_v3 = vpack.c.bf16 %v286_v1, %v285_v0  ;;  %v288_v4 = vld [vmem:[%s6375_s20 + $0x18] sm:$0xff]  ;;  %v378_v7 = vld [vmem:[%s6376_s7] sm:$0xff]  ;;  %v379_v8 = vld [vmem:[%s6376_s7 + $0x8] sm:$0xff]  ;;  %4702 = vmatprep.subr.bf16.mxu0 %v4701_v30  ;;  %s6377_s20 = sld [smem:[#allocation46_spill]] }
 0x14f   :  { %v4685_v6 = vpack.c.bf16 %v288_v4, %v287_v2  ;;  %v4689_v9 = vpack.c.bf16 %v379_v8, %v378_v7  ;;  %v380_v10 = vld [vmem:[%s6376_s7 + $0x10] sm:$0xff]  ;;  %v381_v11 = vld [vmem:[%s6376_s7 + $0x18] sm:$0xff] }
 0x150   :  { %4682 = vmatprep.subr.bf16.mxu1 %v4681_v3  ;;  %v4693_v13 = vpack.c.bf16 %v381_v11, %v380_v10 }
 0x151   :  { %4684 = vmatpush3.bf16.msra.mxu1 %v4681_v3  ;;  %4704 = vmatpush3.bf16.msra.mxu0 %v4701_v30 }
 0x152   :  { %4686 = vmatprep.subr.bf16.mxu1 %v4685_v6  ;;  %4408 = vmatprep.subr.mxu0 %v5374_v14 }
 0x154   :  { %4396 = vmatmul.mubr.msk.f32.vlgmr.msra.gmra.mrb[0].mxu0 %vm296_vm0, %v5781_v12 }
 0x155   :  { %4688 = vmatpush3.bf16.msra.mxu1 %v4685_v6  ;;  %4410 = vmatprep.mubr.msk.f32.mxu0 %vm5375_vm1, %v5374_v14 }
 0x156   :  { %4690 = vmatprep.subr.bf16.mxu1 %v4689_v9 }
 0x158   :  { %4374 = vmatmul.mubr.msk.f32.vlgmr.msra.gmra.mrb[0].mxu1 %vm296_vm0, %v5781_v12 }
 0x159   :  { %4692 = vmatpush3.bf16.msra.mxu1 %v4689_v9  ;;  %4384 = vmatprep.mubr.msk.f32.mxu1 %vm296_vm0, %v5763_v5 }
 0x15a   :  { %4694 = vmatprep.subr.bf16.mxu1 %v4693_v13 }
 0x15d   :  { %4696 = vmatpush3.bf16.msra.mxu1 %v4693_v13 }
 0x15e   :  { %4398 = vmatprep.subr.mxu1 %v5374_v14 }
 0x160   :  { %4385 = vmatmul.mubr.msk.f32.vlgmr.msra.gmra.mrb[2].mxu1 %vm296_vm0, %v5781_v12 }
 0x161   :  { %4400 = vmatprep.mubr.msk.f32.mxu1 %vm5375_vm1, %v5374_v14 }
 0x227   :  { %v4397_v53 = vpop.f32.mrb[0].mxu0 }
 0x228   :  { %v541_v55 = vpop.f32.mrb[1].mxu0  ;;  %v5835_v56 = vadd.f32 %v4397_v53, %v4131_v54 }
 0x229   :  { %v5837_v57 = vadd.f32 %v4131_v54, %v541_v55 }
 0x22b   :  { %v4375_v15 = vpop.f32.mrb[0].mxu1  ;;  %4409 = vmatpush3.msra.mxu0 %v5837_v57 }
 0x22c   :  { %v369_v16 = vpop.f32.mrb[1].mxu1  ;;  %v5811_v24 = vadd.f32 %v4375_v15, %v4125_v21  ;;  %4418 = vmatprep.subr.mxu0 %v5374_v14 }
 0x22d   :  { %v5800_v23 = vadd.f32 %v4125_v21, %v369_v16 }
 0x233   :  { %v4386_v18 = vpop.f32.mrb[2].mxu1 }
 0x234   :  { %v5792_v19 = vadd.f32 %v4386_v18, %v4128_v17  ;;  %v455_v20 = vpop.f32.mrb[3].mxu1 }
 0x235   :  { %v5794_v22 = vadd.f32 %v4128_v17, %v455_v20 }
 0x236   :  { %955 = vrot.lane.b32.xlu1 %v5792_v19, %s5376_s6 }
 0x237   :  { %4399 = vmatpush3.xpose.msk.msra.mxu1 %vm550_vm2, %v5794_v22 }
 0x238   :  { %4403 = vmatprep.subr.mxu1 %v5374_v14 }
 0x23a   :  { %875 = vrot.lane.b32.xlu1 %v5800_v23, %s5376_s6  ;;  %4401 = vmatmul.mubr.msk.f32.vlgmr.msra.gmra.mrb[4].mxu1 %vm550_vm2, %v5800_v23 }
 0x23b   :  { %4404 = vmatpush3.xpose.msk.msra.mxu1 %vm550_vm2, %v5792_v19  ;;  %4405 = vmatprep.mubr.msk.f32.mxu1 %vm5375_vm1, %v5374_v14 }
 0x23c   :  { %4413 = vmatprep.subr.mxu1 %v5374_v14 }
 0x23e   :  { %4406 = vmatmul.mubr.msk.f32.vlgmr.msra.gmra.mrb[6].mxu1 %vm550_vm2, %v5811_v24 }
 0x23f   :  { %4415 = vmatprep.mubr.msk.f32.mxu1 %vm5375_vm1, %v5374_v14  ;;  %4414 = vmatpush3.msra.mxu1 %v5835_v56 }
 0x240   :  { %4423 = vmatprep.subr.mxu1 %v5374_v14 }
 0x2a8   :  { %v956_v58 = vpop.permute.xlu1 %955 }
 0x2ac   :  { %v876_v59 = vpop.permute.xlu1 %875 }
 0x30d   :  { %v623_v31 = vpop.f32.mrb[4].mxu1 }
 0x30e   :  { %v703_v33 = vmul.f32 0.35355338, %v623_v31  ;;  %v4402_v34 = vpop.f32.mrb[5].mxu1 }
 0x310   :  { %v705_v35 = vadd.f32 %v703_v33, %v5823_v32 }
 0x311   :  { %v699_v36 = vpop.f32.mrb[6].mxu1 }
 0x312   :  { %v704_v38 = vmul.f32 0.35355338, %v699_v36  ;;  %v4407_v39 = vpop.f32.mrb[7].mxu1  ;;  %v707_v40 = vsel %vm550_vm2, %v705_v35, -inf }
 0x313   :  { %708 = vmax.xlane.f32.xlu0 %v707_v40 }
 0x314   :  { %v706_v41 = vadd.f32 %v704_v38, %v5826_v37 }
 0x316   :  { %v710_v42 = vsel %vm550_vm2, %v706_v41, -inf }
 0x317   :  { %711 = vmax.xlane.f32.xlu0 %v710_v42 }
 0x32d   :  { %877 = vrot.lane.b32.xlu0 %v5794_v22, %s5376_s6 }
 0x3a0   :  { %v709_v43 = vpop.xlane.xlu0 %708 }
 0x3a1   :  { %v713_v44 = vsub.f32 %v705_v35, %v709_v43 }
 0x3a3   :  { %v715_v45 = vmul.f32 1.442695, %v713_v44 }
 0x3a4   :  { %v712_v46 = vpop.xlane.xlu0 %711 }
 0x3a5   :  { %4911 = vpow2.f32 %v715_v45  ;;  %v714_v47 = vsub.f32 %v706_v41, %v712_v46 }
 0x3a7   :  { %v717_v48 = vmul.f32 1.442695, %v714_v47 }
 0x3a8   :  { %v878_v0 = vpop.permute.xlu0 %877 }
 0x3a9   :  { %4913 = vpow2.f32 %v717_v48 }
 0x3af   :  { %v4912_v49 = vpop.eup %4911 }
 0x3b0   :  { %v719_v50 = vsel %vm550_vm2, %v4912_v49, 0.0 }
 0x3b1   :  { %720 = vadd.xlane.f32.xlu1 %v719_v50 }
 0x3b3   :  { %v4914_v51 = vpop.eup %4913 }
 0x3b4   :  { %v722_v52 = vsel %vm550_vm2, %v4914_v51, 0.0 }
 0x3b5   :  { %723 = vadd.xlane.f32.xlu1 %v722_v52 }
 0x3c6   :  { %953 = vrot.lane.b32.xlu1 %v5811_v24, %s5376_s6 }
 0x43e   :  { %v721_v60 = vpop.xlane.xlu1 %720 }
 0x43f   :  { %4915 = vrcp.f32 %v721_v60 }
 0x442   :  { %v724_v61 = vpop.xlane.xlu1 %723 }
 0x443   :  { %4917 = vrcp.f32 %v724_v61 }
 0x446   :  { %v954_v3 = vpop.permute.xlu1 %953 }
 0x449   :  { %v4916_v62 = vpop.eup %4915 }
 0x44a   :  { %v727_v63 = vmul.f32 %v4916_v62, %v4912_v49 }
 0x44c   :  { %4411 = vmatmul.mubr.msk.f32.vlgmr.msra.gmra.mrb[2].mxu0 %vm550_vm2, %v727_v63 }
 0x44d   :  { %v4918_v1 = vpop.eup %4917  ;;  %4419 = vmatpush3.xpose.msk.msra.mxu0 %vm550_vm2, %v878_v0  ;;  %4420 = vmatprep.mubr.msk.f32.mxu0 %vm5375_vm1, %v5374_v14 }
 0x44e   :  { %v728_v2 = vmul.f32 %v4918_v1, %v4914_v51  ;;  %4428 = vmatprep.subr.mxu0 %v5374_v14 }
 0x450   :  { %4416 = vmatmul.mubr.msk.f32.vlgmr.msra.gmra.mrb[8].mxu1 %vm550_vm2, %v728_v2  ;;  %4421 = vmatmul.mubr.msk.f32.vlgmr.msra.gmra.mrb[4].mxu0 %vm550_vm2, %v876_v59 }
 0x451   :  { %4424 = vmatpush3.xpose.msk.msra.mxu1 %vm550_vm2, %v956_v58  ;;  %4425 = vmatprep.mubr.msk.f32.mxu1 %vm5375_vm1, %v5374_v14 }
 0x452   :  { %4433 = vmatprep.subr.mxu1 %v5374_v14  ;;  %4430 = vmatprep.mubr.msk.f32.mxu0 %vm5375_vm1, %v5374_v14 }
 0x454   :  { %4426 = vmatmul.mubr.msk.f32.vlgmr.msra.gmra.mrb[10].mxu1 %vm550_vm2, %v954_v3 }
 0x455   :  { %4435 = vmatprep.mubr.msk.f32.mxu1 %vm5375_vm1, %v5374_v14 }
 0x51f   :  { %v5861_v4 = vpop.f32.mrb[2].mxu0 }
 0x520   :  { %v4412_v6 = vpop.f32.mrb[3].mxu0 }
 0x523   :  { %v5863_v7 = vpop.f32.mrb[8].mxu1  ;;  %v949_v8 = vpop.f32.mrb[4].mxu0 }
 0x524   :  { %v1031_v9 = vmul.f32 0.35355338, %v949_v8  ;;  %v4417_v10 = vpop.f32.mrb[9].mxu1  ;;  %v4422_v11 = vpop.f32.mrb[5].mxu0 }
 0x526   :  { %v1033_v13 = vadd.f32 %v1031_v9, %v5823_v32 }
 0x527   :  { %v1027_v15 = vpop.f32.mrb[10].mxu1 }
 0x528   :  { %v1032_v16 = vmul.f32 0.35355338, %v1027_v15  ;;  %v4427_v17 = vpop.f32.mrb[11].mxu1  ;;  %v1035_v18 = vsel %vm550_vm2, %v1033_v13, -inf }
 0x529   :  { %1036 = vmax.xlane.f32.xlu0 %v1035_v18 }
 0x52a   :  { %v1034_v20 = vadd.f32 %v1032_v16, %v5826_v37 }
 0x52c   :  { %v1038_v21 = vsel %vm550_vm2, %v1034_v20, -inf }
 0x52d   :  { %1039 = vmax.xlane.f32.xlu1 %v1038_v21 }
 0x53e   :  { %1135 = vrot.lane.b32.xlu1 %v5835_v56, %s5376_s6 }
 0x53f   :  { %1058 = vrot.lane.b32.xlu0 %v5837_v57, %s5376_s6 }
 0x542   :  { %1213 = vrot.lane.b32.xlu1 %v5794_v22, %s5377_s2 }
 0x546   :  { %1291 = vrot.lane.b32.xlu1 %v5792_v19, %s5377_s2 }
 0x54a   :  { %1289 = vrot.lane.b32.xlu1 %v5811_v24, %s5377_s2 }
 0x5b6   :  { %v1037_v25 = vpop.xlane.xlu0 %1036 }
 0x5b7   :  { %v1041_v26 = vsub.f32 %v1033_v13, %v1037_v25 }
 0x5b9   :  { %v1043_v27 = vmul.f32 1.442695, %v1041_v26 }
 0x5ba   :  { %v1059_v28 = vpop.permute.xlu0 %1058  ;;  %v1040_v29 = vpop.xlane.xlu1 %1039 }
 0x5bb   :  { %4919 = vpow2.f32 %v1043_v27  ;;  %v1042_v30 = vsub.f32 %v1034_v20, %v1040_v29  ;;  %4429 = vmatpush3.msra.mxu0 %v1059_v28 }
 0x5bc   :  { %4438 = vmatprep.subr.mxu0 %v5374_v14 }
 0x5bd   :  { %v1045_v31 = vmul.f32 1.442695, %v1042_v30 }
 0x5be   :  { %v1136_v33 = vpop.permute.xlu1 %1135 }
 0x5bf   :  { %4921 = vpow2.f32 %v1045_v31  ;;  %4434 = vmatpush3.msra.mxu1 %v1136_v33 }
 0x5c0   :  { %4443 = vmatprep.subr.mxu1 %v5374_v14 }
 0x5c2   :  { %v1214_v41 = vpop.permute.xlu1 %1213 }
 0x5c5   :  { %v4920_v34 = vpop.eup %4919 }
 0x5c6   :  { %v1047_v35 = vsel %vm550_vm2, %v4920_v34, 0.0  ;;  %v1292_v45 = vpop.permute.xlu1 %1291 }
 0x5c7   :  { %1048 = vadd.xlane.f32.xlu0 %v1047_v35 }
 0x5c9   :  { %v4922_v36 = vpop.eup %4921 }
 0x5ca   :  { %v1050_v38 = vsel %vm550_vm2, %v4922_v36, 0.0  ;;  %v1290_v48 = vpop.permute.xlu1 %1289 }
 0x5cb   :  { %1051 = vadd.xlane.f32.xlu0 %v1050_v38 }
 0x5e1   :  { %1211 = vrot.lane.b32.xlu0 %v5800_v23, %s5377_s2 }
 0x654   :  { %v1049_v39 = vpop.xlane.xlu0 %1048 }
 0x655   :  { %4923 = vrcp.f32 %v1049_v39 }
 0x658   :  { %v1052_v40 = vpop.xlane.xlu0 %1051 }
 0x659   :  { %4925 = vrcp.f32 %v1052_v40 }
 0x65c   :  { %v1212_v47 = vpop.permute.xlu0 %1211 }
 0x65f   :  { %v4924_v42 = vpop.eup %4923 }
 0x660   :  { %v1055_v43 = vmul.f32 %v4924_v42, %v4920_v34 }
 0x662   :  { %4431 = vmatmul.mubr.msk.f32.vlgmr.msra.gmra.mrb[6].mxu0 %vm550_vm2, %v1055_v43 }
 0x663   :  { %v4926_v44 = vpop.eup %4925  ;;  %4439 = vmatpush3.xpose.msk.msra.mxu0 %vm550_vm2, %v1214_v41  ;;  %4440 = vmatprep.mubr.msk.f32.mxu0 %vm5375_vm1, %v5374_v14 }
 0x664   :  { %v1056_v46 = vmul.f32 %v4926_v44, %v4922_v36  ;;  %4448 = vmatprep.subr.mxu0 %v5374_v14 }
 0x666   :  { %4436 = vmatmul.mubr.msk.f32.vlgmr.msra.gmra.mrb[12].mxu1 %vm550_vm2, %v1056_v46  ;;  %4441 = vmatmul.mubr.msk.f32.vlgmr.msra.gmra.mrb[8].mxu0 %vm550_vm2, %v1212_v47 }
 0x667   :  { %4444 = vmatpush3.xpose.msk.msra.mxu1 %vm550_vm2, %v1292_v45  ;;  %4445 = vmatprep.mubr.msk.f32.mxu1 %vm5375_vm1, %v5374_v14 }
 0x668   :  { %4453 = vmatprep.subr.mxu1 %v5374_v14  ;;  %4450 = vmatprep.mubr.msk.f32.mxu0 %vm5375_vm1, %v5374_v14 }
 0x66a   :  { %4446 = vmatmul.mubr.msk.f32.vlgmr.msra.gmra.mrb[14].mxu1 %vm550_vm2, %v1290_v48 }
 0x66b   :  { %4455 = vmatprep.mubr.msk.f32.mxu1 %vm5375_vm1, %v5374_v14 }
 0x735   :  { %v5901_v49 = vpop.f32.mrb[6].mxu0 }
 0x736   :  { %v4432_v50 = vpop.f32.mrb[7].mxu0 }
 0x739   :  { %v5903_v51 = vpop.f32.mrb[12].mxu1  ;;  %v1285_v52 = vpop.f32.mrb[8].mxu0 }
 0x73a   :  { %v1367_v53 = vmul.f32 0.35355338, %v1285_v52  ;;  %v4437_v54 = vpop.f32.mrb[13].mxu1  ;;  %v4442_v55 = vpop.f32.mrb[9].mxu0 }
 0x73c   :  { %v1369_v58 = vadd.f32 %v1367_v53, %v5823_v32 }
 0x73d   :  { %v1363_v59 = vpop.f32.mrb[14].mxu1 }
 0x73e   :  { %v1368_v60 = vmul.f32 0.35355338, %v1363_v59  ;;  %v4447_v61 = vpop.f32.mrb[15].mxu1  ;;  %v1371_v62 = vsel %vm550_vm2, %v1369_v58, -inf }
 0x73f   :  { %1372 = vmax.xlane.f32.xlu0 %v1371_v62  ;;  %v1912_v61 = vld [vmem:[%s6377_s20 + $0x8] sm:$0xff] }
 0x740   :  { %v1370_v63 = vadd.f32 %v1368_v60, %v5826_v37 }
 0x742   :  { %v1374_v0 = vsel %vm550_vm2, %v1370_v63, -inf }
 0x743   :  { %1375 = vmax.xlane.f32.xlu1 %v1374_v0  ;;  %v1914_v0 = vld [vmem:[%s6377_s20 + $0x18] sm:$0xff] }
 0x754   :  { %1469 = vrot.lane.b32.xlu1 %v5835_v56, %s5377_s2 }
 0x755   :  { %1393 = vrot.lane.b32.xlu0 %v5837_v57, %s5377_s2 }
 0x758   :  { %1547 = vrot.lane.b32.xlu1 %v5794_v22, %s5378_s16 }
 0x75c   :  { %1625 = vrot.lane.b32.xlu1 %v5792_v19, %s5378_s16 }
 0x760   :  { %1623 = vrot.lane.b32.xlu1 %v5811_v24, %s5378_s16 }
 0x7cc   :  { %v1373_v1 = vpop.xlane.xlu0 %1372 }
 0x7cd   :  { %v1377_v2 = vsub.f32 %v1369_v58, %v1373_v1 }
 0x7cf   :  { %v1379_v3 = vmul.f32 1.442695, %v1377_v2 }
 0x7d0   :  { %v1394_v6 = vpop.permute.xlu0 %1393  ;;  %v1376_v8 = vpop.xlane.xlu1 %1375 }
 0x7d1   :  { %4927 = vpow2.f32 %v1379_v3  ;;  %v1378_v9 = vsub.f32 %v1370_v63, %v1376_v8  ;;  %4449 = vmatpush3.msra.mxu0 %v1394_v6  ;;  %v1913_v63 = vld [vmem:[%s6377_s20 + $0x10] sm:$0xff] }
 0x7d2   :  { %4458 = vmatprep.subr.mxu0 %v5374_v14  ;;  %v4709_v1 = vpack.c.bf16 %v1914_v0, %v1913_v63 }
 0x7d3   :  { %v1381_v10 = vmul.f32 1.442695, %v1378_v9 }
 0x7d4   :  { %v1470_v11 = vpop.permute.xlu1 %1469 }
 0x7d5   :  { %4929 = vpow2.f32 %v1381_v10  ;;  %4454 = vmatpush3.msra.mxu1 %v1470_v11 }
 0x7d6   :  { %4463 = vmatprep.subr.mxu1 %v5374_v14 }
 0x7d8   :  { %v1548_v17 = vpop.permute.xlu1 %1547 }
 0x7db   :  { %v4928_v19 = vpop.eup %4927 }
 0x7dc   :  { %v1383_v22 = vsel %vm550_vm2, %v4928_v19, 0.0  ;;  %v1626_v25 = vpop.permute.xlu1 %1625 }
 0x7dd   :  { %1384 = vadd.xlane.f32.xlu0 %v1383_v22 }
 0x7df   :  { %v4930_v24 = vpop.eup %4929 }
 0x7e0   :  { %v1386_v13 = vsel %vm550_vm2, %v4930_v24, 0.0  ;;  %v1624_v27 = vpop.permute.xlu1 %1623 }
 0x7e1   :  { %1387 = vadd.xlane.f32.xlu0 %v1386_v13 }
 0x7f7   :  { %1545 = vrot.lane.b32.xlu0 %v5800_v23, %s5378_s16 }
 0x86a   :  { %v1385_v15 = vpop.xlane.xlu0 %1384 }
 0x86b   :  { %4931 = vrcp.f32 %v1385_v15 }
 0x86e   :  { %v1388_v16 = vpop.xlane.xlu0 %1387 }
 0x86f   :  { %4933 = vrcp.f32 %v1388_v16 }
 0x872   :  { %v1546_v23 = vpop.permute.xlu0 %1545 }
 0x875   :  { %v4932_v18 = vpop.eup %4931 }
 0x876   :  { %v1391_v20 = vmul.f32 %v4932_v18, %v4928_v19 }
 0x878   :  { %4451 = vmatmul.mubr.msk.f32.vlgmr.msra.gmra.mrb[10].mxu0 %vm550_vm2, %v1391_v20 }
 0x879   :  { %v4934_v21 = vpop.eup %4933  ;;  %4459 = vmatpush3.xpose.msk.msra.mxu0 %vm550_vm2, %v1548_v17  ;;  %4460 = vmatprep.mubr.msk.f32.mxu0 %vm5375_vm1, %v5374_v14 }
 0x87a   :  { %v1392_v26 = vmul.f32 %v4934_v21, %v4930_v24  ;;  %4468 = vmatprep.subr.mxu0 %v5374_v14 }
 0x87c   :  { %4456 = vmatmul.mubr.msk.f32.vlgmr.msra.gmra.mrb[16].mxu1 %vm550_vm2, %v1392_v26  ;;  %4461 = vmatmul.mubr.msk.f32.vlgmr.msra.gmra.mrb[12].mxu0 %vm550_vm2, %v1546_v23 }
 0x87d   :  { %4464 = vmatpush3.xpose.msk.msra.mxu1 %vm550_vm2, %v1626_v25  ;;  %4465 = vmatprep.mubr.msk.f32.mxu1 %vm5375_vm1, %v5374_v14 }
 0x87e   :  { %4473 = vmatprep.subr.mxu1 %v5374_v14  ;;  %4470 = vmatprep.mubr.msk.f32.mxu0 %vm5375_vm1, %v5374_v14 }
 0x880   :  { %4466 = vmatmul.mubr.msk.f32.vlgmr.msra.gmra.mrb[18].mxu1 %vm550_vm2, %v1624_v27 }
 0x881   :  { %4475 = vmatprep.mubr.msk.f32.mxu1 %vm5375_vm1, %v5374_v14 }
 0x94b   :  { %v1465_v28 = vpop.f32.mrb[10].mxu0 }
 0x94c   :  { %v4452_v29 = vpop.f32.mrb[11].mxu0 }
 0x94f   :  { %v1541_v30 = vpop.f32.mrb[16].mxu1  ;;  %v1619_v31 = vpop.f32.mrb[12].mxu0 }
 0x950   :  { %v1701_v33 = vmul.f32 0.35355338, %v1619_v31  ;;  %v4457_v34 = vpop.f32.mrb[17].mxu1  ;;  %v4462_v35 = vpop.f32.mrb[13].mxu0 }
 0x952   :  { %v1703_v36 = vadd.f32 %v1701_v33, %v5823_v32 }
 0x953   :  { %v1697_v38 = vpop.f32.mrb[18].mxu1 }
 0x954   :  { %v1702_v39 = vmul.f32 0.35355338, %v1697_v38  ;;  %v4467_v40 = vpop.f32.mrb[19].mxu1  ;;  %v1705_v41 = vsel %vm550_vm2, %v1703_v36, -inf }
 0x955   :  { %1706 = vmax.xlane.f32.xlu0 %v1705_v41  ;;  %v2141_v41 = vld [vmem:[#allocation19 + $0x8] sm:$0xff] }
 0x956   :  { %v1704_v42 = vadd.f32 %v1702_v39, %v5826_v37 }
 0x958   :  { %v1708_v43 = vsel %vm550_vm2, %v1704_v42, -inf }
 0x959   :  { %1709 = vmax.xlane.f32.xlu1 %v1708_v43  ;;  %v2142_v43 = vld [vmem:[#allocation19 + $0x10] sm:$0xff] }
 0x96a   :  { %1803 = vrot.lane.b32.xlu1 %v5835_v56, %s5378_s16 }
 0x96e   :  { %1881 = vrot.lane.b32.xlu1 %v5901_v49, %s6369_s0 }
 0x972   :  { %1883 = vrot.lane.b32.xlu1 %v5903_v51, %s6369_s0 }
 0x976   :  { %1891 = vrot.lane.b32.xlu1 %v1541_v30, %s5379_s9 }
 0x9e2   :  { %v1707_v32 = vpop.xlane.xlu0 %1706 }
 0x9e3   :  { %v1711_v44 = vsub.f32 %v1703_v36, %v1707_v32  ;;  %v2143_v32 = vld [vmem:[#allocation19 + $0x18] sm:$0xff] }
 0x9e5   :  { %v1713_v45 = vmul.f32 1.442695, %v1711_v44  ;;  %v4725_v44 = vpack.c.bf16 %v2143_v32, %v2142_v43 }
 0x9e6   :  { %v1710_v46 = vpop.xlane.xlu1 %1709 }
 0x9e7   :  { %4935 = vpow2.f32 %v1713_v45  ;;  %v1712_v37 = vsub.f32 %v1704_v42, %v1710_v46  ;;  %v275_v45 = vld [vmem:[%s6378_s27] sm:$0xff]  ;;  %v276_v46 = vld [vmem:[%s6378_s27 + $0x8] sm:$0xff] }
 0x9e9   :  { %v1715_v47 = vmul.f32 1.442695, %v1712_v37  ;;  %v277_v37 = vld [vmem:[%s6378_s27 + $0x10] sm:$0xff] }
 0x9ea   :  { %v1804_v48 = vpop.permute.xlu1 %1803 }
 0x9eb   :  { %4937 = vpow2.f32 %v1715_v47  ;;  %4474 = vmatpush3.msra.mxu1 %v1804_v48  ;;  %v278_v47 = vld [vmem:[%s6378_s27 + $0x18] sm:$0xff] }
 0x9ec   :  { %v2048_v48 = vld [vmem:[#allocation16] sm:$0xff] }
 0x9ee   :  { %v1882_v9 = vpop.permute.xlu1 %1881 }
 0x9ef   :  { %v1903_v19 = vsel %vm550_vm2, %v5861_v4, %v1882_v9  ;;  %v4158_v4 = vld [vmem:[#allocation14] ss:$0 sm:$0xff] }
 0x9f1   :  { %v4936_v56 = vpop.eup %4935 }
 0x9f2   :  { %v1717_v50 = vsel %vm550_vm2, %v4936_v56, 0.0  ;;  %v1884_v10 = vpop.permute.xlu1 %1883 }
 0x9f3   :  { %1718 = vadd.xlane.f32.xlu0 %v1717_v50  ;;  %v1904_v16 = vsel %vm550_vm2, %v5863_v7, %v1884_v10 }
 0x9f5   :  { %v4938_v49 = vpop.eup %4937 }
 0x9f6   :  { %v1720_v51 = vsel %vm550_vm2, %v4938_v49, 0.0  ;;  %v1892_v22 = vpop.permute.xlu1 %1891 }
 0x9f7   :  { %1721 = vadd.xlane.f32.xlu0 %v1720_v51  ;;  %v1907_v17 = vsel %vm1905_vm4, %v1904_v16, %v1892_v22  ;;  %v2051_v51 = vld [vmem:[#allocation16 + $0x18] sm:$0xff] }
 0xa0d   :  { %1727 = vrot.lane.b32.xlu0 %v5837_v57, %s5378_s16  ;;  %v1911_v57 = vld [vmem:[%s6377_s20] sm:$0xff] }
 0xa0e   :  { %v4705_v62 = vpack.c.bf16 %v1912_v61, %v1911_v57 }
 0xa11   :  { %1889 = vrot.lane.b32.xlu0 %v1465_v28, %s5379_s9 }
 0xa80   :  { %v1719_v52 = vpop.xlane.xlu0 %1718 }
 0xa81   :  { %4939 = vrcp.f32 %v1719_v52 }
 0xa84   :  { %v1722_v53 = vpop.xlane.xlu0 %1721 }
 0xa85   :  { %4941 = vrcp.f32 %v1722_v53  ;;  %v2248_v53 = vld [vmem:[#allocation22] sm:$0xff] }
 0xa88   :  { %v1728_v54 = vpop.permute.xlu0 %1727 }
 0xa89   :  { %4469 = vmatpush3.msra.mxu0 %v1728_v54  ;;  %v2249_v54 = vld [vmem:[#allocation22 + $0x8] sm:$0xff] }
 0xa8a   :  { %4706 = vmatprep.subr.bf16.mxu0 %v4705_v62 }
 0xa8b   :  { %v4940_v55 = vpop.eup %4939 }
 0xa8c   :  { %v1725_v58 = vmul.f32 %v4940_v55, %v4936_v56  ;;  %v1890_v11 = vpop.permute.xlu0 %1889  ;;  %v2049_v56 = vld [vmem:[#allocation16 + $0x8] sm:$0xff]  ;;  %v4729_v55 = vpack.c.bf16 %v2249_v54, %v2248_v53 }
 0xa8d   :  { %v1906_v24 = vsel %vm1905_vm4, %v1903_v19, %v1890_v11  ;;  %v4713_v50 = vpack.c.bf16 %v2049_v56, %v2048_v48  ;;  %v2250_v11 = vld [vmem:[#allocation22 + $0x10] sm:$0xff]  ;;  %v2251_v19 = vld [vmem:[#allocation22 + $0x18] sm:$0xff] }
 0xa8e   :  { %4471 = vmatmul.mubr.msk.f32.vlgmr.msra.gmra.mrb[14].mxu0 %vm550_vm2, %v1725_v58  ;;  %v5381_v58 = vmov 0.0|0.0  }
 0xa8f   :  { %v4942_v59 = vpop.eup %4941  ;;  %4708 = vmatpush3.bf16.msra.mxu0 %v4705_v62  ;;  %4714 = vmatprep.subr.bf16.mxu1 %v4713_v50 }
 0xa90   :  { %v1726_v60 = vmul.f32 %v4942_v59, %v4938_v49  ;;  %4710 = vmatprep.subr.bf16.mxu0 %v4709_v1  ;;  %v2050_v49 = vld [vmem:[#allocation16 + $0x10] sm:$0xff] }
 0xa91   :  { %v4717_v52 = vpack.c.bf16 %v2051_v51, %v2050_v49 }
 0xa92   :  { %4476 = vmatmul.mubr.msk.f32.vlgmr.msra.gmra.mrb[20].mxu1 %vm550_vm2, %v1726_v60 }
 0xa93   :  { %4712 = vmatpush3.bf16.msra.mxu0 %v4709_v1  ;;  %4716 = vmatpush3.bf16.msra.mxu1 %v4713_v50  ;;  %v6011_v1 = vld [vmem:[%s6335_s24] ss:$0 sm:$0xff] }
 0xa94   :  { %4718 = vmatprep.subr.bf16.mxu1 %v4717_v52  ;;  %v6077_v50 = vld [vmem:[#allocation2] sm:$0xff] }
 0xa97   :  { %4720 = vmatpush3.bf16.msra.mxu1 %v4717_v52 }
 0xa98   :  { %4730 = vmatprep.subr.bf16.mxu1 %v4729_v55 }
 0xb61   :  { %v1799_v2 = vpop.f32.mrb[14].mxu0 }
 0xb62   :  { %1897 = vrot.lane.b32.xlu0 %v1799_v2, %s5380_s28  ;;  %v4472_v3 = vpop.f32.mrb[15].mxu0 }
 0xb63   :  { %v6016_v3 = vld [vmem:[%s6336_s25] ss:$0 sm:$0xff] }
 0xb65   :  { %v1875_v6 = vpop.f32.mrb[20].mxu1 }
 0xb66   :  { %1899 = vrot.lane.b32.xlu1 %v1875_v6, %s5380_s28  ;;  %v4477_v8 = vpop.f32.mrb[21].mxu1 }
 0xbd4   :  { %v1898_v13 = vpop.permute.xlu0 %1897 }
 0xbd5   :  { %v1909_v15 = vsel %vm1908_vm3, %v1906_v24, %v1898_v13  ;;  %v4733_v13 = vpack.c.bf16 %v2251_v19, %v2250_v11 }
 0xbd6   :  { %4486 = vmatprep.mubr.msk.f32.mxu0 %vm296_vm0, %v1909_v15  ;;  %v4166_v15 = vld [vmem:[#allocation20] ss:$0 sm:$0xff] }
 0xbd8   :  { %v1900_v18 = vpop.permute.xlu1 %1899 }
 0xbd9   :  { %v1910_v20 = vsel %vm1908_vm3, %v1907_v17, %v1900_v18 }
 0xbda   :  { %4487 = vmatmul.mubr.msk.f32.vlgmr.msra.gmra.mrb[16].mxu0 %vm296_vm0, %v1910_v20 }
 0xbdb   :  { %4508 = vmatprep.mubr.msk.f32.mxu0 %vm296_vm0, %v275_v45 }
 0xcad   :  { %v4488_v21 = vpop.f32.mrb[16].mxu0 }
 0xcae   :  { %v2000_v25 = vadd.f32 %v4488_v21, %v4158_v4  ;;  %v1994_v26 = vpop.f32.mrb[17].mxu0 }
 0xcaf   :  { %v1995_v23 = vadd.f32 %v4158_v4, %v1994_v26 }
 0xcb0   :  { %v2004_v27 = vadd.f32 %v2000_v25, %v5781_v12 }
 0xcb1   :  { %v2003_v28 = vadd.f32 %v1995_v23, %v5763_v5  ;;  %v2140_v5 = vld [vmem:[#allocation19] sm:$0xff] }
 0xcb2   :  { %v2008_v29 = vsel %vm296_vm0, %v2004_v27, 0.0  ;;  %v4721_v42 = vpack.c.bf16 %v2141_v41, %v2140_v5 }
 0xcb3   :  { %2009 = vadd.xlane.f32.xlu1 %v2008_v29  ;;  %v2005_v7 = vsel %vm296_vm0, %v2003_v28, 0.0 }
 0xcb4   :  { %2006 = vadd.xlane.f32.xlu0 %v2005_v7  ;;  %4722 = vmatprep.subr.bf16.mxu0 %v4721_v42 }
 0xcb5   :  { %4724 = vmatpush3.bf16.msra.mxu0 %v4721_v42 }
 0xcb6   :  { %4726 = vmatprep.subr.bf16.mxu0 %v4725_v44 }
 0xcb9   :  { %4728 = vmatpush3.bf16.msra.mxu0 %v4725_v44 }
 0xcba   :  { %4737 = vmatprep.subr.bf16.mxu0 %v5381_v58 }
 0xcbc   :  { %4509 = vmatmul.mubr.msk.f32.vlgmr.msra.gmra.mrb[18].mxu0 %vm296_vm0, %v276_v46 }
 0xcbd   :  { %4511 = vmatprep.mubr.msk.f32.mxu0 %vm296_vm0, %v277_v37 }
 0xcc0   :  { %4512 = vmatmul.mubr.msk.f32.gmra.mrb[20].mxu0 %vm296_vm0, %v278_v47 }
 0xcc1   :  { %4532 = vmatprep.mubr.msk.f32.mxu0 %vm5375_vm1, %v5374_v14 }
 0xd40   :  { %v2010_v30 = vpop.xlane.xlu1 %2009 }
 0xd41   :  { %v2013_v31 = vmul.f32 0.03125, %v2010_v30  ;;  %v2007_v33 = vpop.xlane.xlu0 %2006  ;;  %v4163_v30 = vld [vmem:[#allocation17] ss:$0 sm:$0xff] }
 0xd42   :  { %v2012_v34 = vmul.f32 0.03125, %v2007_v33 }
 0xd43   :  { %v2015_v35 = vsub.f32 %v2004_v27, %v2013_v31 }
 0xd44   :  { %v2014_v36 = vsub.f32 %v2003_v28, %v2012_v34 }
 0xd45   :  { %v2017_v40 = vmul.f32 %v2015_v35, %v2015_v35 }
 0xd46   :  { %v2016_v38 = vmul.f32 %v2014_v36, %v2014_v36 }
 0xd47   :  { %v2021_v12 = vsel %vm296_vm0, %v2017_v40, 0.0 }
 0xd48   :  { %v2018_v39 = vsel %vm296_vm0, %v2016_v38, 0.0 }
 0xd49   :  { %2019 = vadd.xlane.f32.xlu0 %v2018_v39 }
 0xd4d   :  { %2022 = vadd.xlane.f32.xlu0 %v2021_v12 }
 0xd8f   :  { %v4510_v16 = vpop.f32.mrb[18].mxu0 }
 0xd90   :  { %v2235_v17 = vadd.f32 %v4510_v16, %v4166_v15  ;;  %v2229_v18 = vpop.f32.mrb[19].mxu0 }
 0xd91   :  { %v2230_v20 = vadd.f32 %v4166_v15, %v2229_v18 }
 0xd93   :  { %v4738_v21 = vpack.c.bf16 %v2235_v17, %v2230_v20  ;;  %v4513_v25 = vpop.f32.mrb[20].mxu0  ;;  %v6043_v26 = vpack.i.bf16 %v2235_v17, %v2230_v20 }
 0xd94   :  { %v2245_v23 = vadd.f32 %v4513_v25, %v4166_v15  ;;  %v2239_v27 = vpop.f32.mrb[21].mxu0 }
 0xd95   :  { %v2240_v28 = vadd.f32 %v4166_v15, %v2239_v27  ;;  %4740 = vmatpush3.bf16.xpose.msk.msra.mxu0 %vm6039_vm5, %v4738_v21 }
 0xd96   :  { %4745 = vmatprep.subr.bf16.mxu0 %v5381_v58 }
 0xd97   :  { %v4742_v29 = vpack.c.bf16 %v2245_v23, %v2240_v28  ;;  %v6048_v7 = vpack.i.bf16 %v2245_v23, %v2240_v28 }
 0xdd6   :  { %v2020_v59 = vpop.xlane.xlu0 %2019 }
 0xdd7   :  { %v2024_v60 = vmul.f32 0.03125, %v2020_v59 }
 0xdd9   :  { %v2026_v57 = vadd.f32 1e-05, %v2024_v60 }
 0xdda   :  { %v2023_v61 = vpop.xlane.xlu0 %2022 }
 0xddb   :  { %4943 = vrsqrt.f32 %v2026_v57  ;;  %v2025_v62 = vmul.f32 0.03125, %v2023_v61 }
 0xddd   :  { %v2027_v63 = vadd.f32 1e-05, %v2025_v62 }
 0xddf   :  { %4945 = vrsqrt.f32 %v2027_v63 }
 0xde5   :  { %v4944_v0 = vpop.eup %4943 }
 0xde6   :  { %v2030_v2 = vmul.f32 %v4944_v0, %v2014_v36  ;;  %v4171_v36 = vld [vmem:[#allocation23] ss:$0 sm:$0xff] }
 0xde8   :  { %v2038_v6 = vmul.f32 %v6011_v1, %v2030_v2 }
 0xde9   :  { %v4946_v8 = vpop.eup %4945 }
 0xdea   :  { %v2031_v9 = vmul.f32 %v4946_v8, %v2015_v35  ;;  %v6020_v10 = vadd.f32 %v6016_v3, %v2038_v6 }
 0xdec   :  { %4497 = vmatprep.mubr.msk.f32.mxu1 %vm296_vm0, %v6020_v10  ;;  %v2039_v22 = vmul.f32 %v6011_v1, %v2031_v9 }
 0xdee   :  { %v6026_v24 = vadd.f32 %v6016_v3, %v2039_v22 }
 0xdf0   :  { %4498 = vmatmul.mubr.msk.f32.vlgmr.msra.gmra.mrb[22].mxu1 %vm296_vm0, %v6026_v24 }
 0xdf1   :  { %4732 = vmatpush3.bf16.msra.mxu1 %v4729_v55  ;;  %4522 = vmatprep.mubr.msk.f32.mxu1 %vm296_vm0, %v275_v45 }
 0xdf2   :  { %4734 = vmatprep.subr.bf16.mxu1 %v4733_v13 }
 0xdf5   :  { %4736 = vmatpush3.bf16.msra.mxu1 %v4733_v13 }
 0xdf6   :  { %4741 = vmatprep.subr.bf16.mxu1 %v5381_v58 }
 0xdf8   :  { %4523 = vmatmul.mubr.msk.f32.vlgmr.msra.gmra.mrb[24].mxu1 %vm296_vm0, %v276_v46 }
 0xdf9   :  { %4525 = vmatprep.mubr.msk.f32.mxu1 %vm296_vm0, %v277_v37  ;;  %v6075_v37 = vld [vmem:[#allocation2 + $0x8] sm:$0xff] }
 0xdfc   :  { %4526 = vmatmul.mubr.msk.f32.gmra.mrb[26].mxu1 %vm296_vm0, %v278_v47 }
 0xdfd   :  { %4539 = vmatprep.mubr.msk.f32.mxu1 %vm5375_vm1, %v5374_v14 }
 0xdfe   :  { %4744 = vmatpush3.bf16.xpose.msk.msra.mxu1 %vm6039_vm5, %v4742_v29 }
 0xdff   :  { %4748 = vmatprep.subr.bf16.mxu1 %v5381_v58 }
 0xec3   :  { %v4499_v31 = vpop.f32.mrb[22].mxu1 }
 0xec4   :  { %v6053_v33 = vadd.f32 %v4499_v31, %v4163_v30  ;;  %v2131_v34 = vpop.f32.mrb[23].mxu1 }
 0xec5   :  { %v6055_v35 = vadd.f32 %v4163_v30, %v2131_v34 }
 0xec6   :  { %4540 = vmatmul.mubr.msk.f32.vlgmr.msra.gmra.mrb[28].mxu1 %vm550_vm2, %v6053_v33 }
 0xec7   :  { %4533 = vmatmul.mubr.msk.f32.vlgmr.msra.gmra.mrb[22].mxu0 %vm550_vm2, %v6055_v35  ;;  %4553 = vmatprep.mubr.msk.f32.mxu1 %vm5375_vm1, %v5374_v14 }
 0xec8   :  { %4546 = vmatprep.mubr.msk.f32.mxu0 %vm5375_vm1, %v5374_v14 }
 0xecb   :  { %v4524_v38 = vpop.f32.mrb[24].mxu1 }
 0xecc   :  { %v6065_v39 = vadd.f32 %v4524_v38, %v4171_v36  ;;  %v2325_v40 = vpop.f32.mrb[25].mxu1 }
 0xecd   :  { %v6067_v12 = vadd.f32 %v4171_v36, %v2325_v40 }
 0xecf   :  { %v4527_v5 = vpop.f32.mrb[26].mxu1  ;;  %v4746_v41 = vpack.c.bf16 %v6065_v39, %v6067_v12 }
 0xed0   :  { %v2341_v42 = vadd.f32 %v4527_v5, %v4171_v36  ;;  %v2335_v43 = vpop.f32.mrb[27].mxu1 }
 0xed1   :  { %v2336_v32 = vadd.f32 %v4171_v36, %v2335_v43  ;;  %4747 = vmatpush3.bf16.msra.mxu0 %v4746_v41 }
 0xed2   :  { %4751 = vmatprep.subr.bf16.mxu0 %v5381_v58 }
 0xed3   :  { %v4749_v44 = vpack.c.bf16 %v2341_v42, %v2336_v32  ;;  %v6072_v45 = vpack.i.bf16 %v2341_v42, %v2336_v32 }
 0xed5   :  { %4750 = vmatpush3.bf16.msra.mxu1 %v4749_v44 }
 0xed6   :  { %4755 = vmatprep.subr.bf16.mxu1 %v5381_v58 }
 0xf99   :  { %v2498_v46 = vpop.f32.mrb[28].mxu1 }
 0xf9a   :  { %v2503_v47 = vmul.f32 0.35355338, %v2498_v46  ;;  %v2419_v48 = vpop.f32.mrb[22].mxu0  ;;  %v4541_v56 = vpop.f32.mrb[29].mxu1 }
 0xf9b   :  { %v2502_v49 = vmul.f32 0.35355338, %v2419_v48  ;;  %v4534_v51 = vpop.f32.mrb[23].mxu0 }
 0xf9c   :  { %v2505_v52 = vadd.f32 %v2503_v47, %v6075_v37 }
 0xf9d   :  { %v2504_v53 = vadd.f32 %v2502_v49, %v6077_v50 }
 0xf9e   :  { %v2509_v54 = vsel %vm1905_vm4, %v2505_v52, -inf }
 0xf9f   :  { %2510 = vmax.xlane.f32.xlu1 %v2509_v54  ;;  %v2506_v55 = vsel %vm1905_vm4, %v2504_v53, -inf }
 0xfa0   :  { %2507 = vmax.xlane.f32.xlu0 %v2506_v55 }
0x102c   :  { %v2511_v59 = vpop.xlane.xlu1 %2510 }
0x102d   :  { %v2513_v60 = vsub.f32 %v2505_v52, %v2511_v59  ;;  %v2508_v57 = vpop.xlane.xlu0 %2507 }
0x102e   :  { %v2512_v61 = vsub.f32 %v2504_v53, %v2508_v57 }
0x102f   :  { %v2516_v62 = vmul.f32 1.442695, %v2513_v60 }
0x1030   :  { %v2514_v63 = vmul.f32 1.442695, %v2512_v61 }
0x1031   :  { %4947 = vpow2.f32 %v2516_v62 }
0x1032   :  { %4949 = vpow2.f32 %v2514_v63 }
0x103b   :  { %v4948_v0 = vpop.eup %4947 }
0x103c   :  { %v4950_v2 = vpop.eup %4949  ;;  %v2521_v6 = vsel %vm1905_vm4, %v4948_v0, 0.0 }
0x103d   :  { %2522 = vadd.xlane.f32.xlu1 %v2521_v6  ;;  %v2518_v8 = vsel %vm1905_vm4, %v4950_v2, 0.0 }
0x103e   :  { %2519 = vadd.xlane.f32.xlu0 %v2518_v8 }
0x104e   :  { %4857 = vrot.lane.b32.xlu1 %v6048_v7, %s5376_s6 }
0x1052   :  { %2674 = vrot.lane.b32.xlu1 %v6055_v35, %s5376_s6 }
0x1054   :  { %4852 = vrot.lane.b32.xlu0 %v6043_v26, %s5376_s6 }
0x1056   :  { %2756 = vrot.lane.b32.xlu1 %v6053_v33, %s5376_s6 }
0x10ca   :  { %v2523_v9 = vpop.xlane.xlu1 %2522 }
0x10cb   :  { %4951 = vrcp.f32 %v2523_v9  ;;  %v2520_v11 = vpop.xlane.xlu0 %2519 }
0x10cc   :  { %4953 = vrcp.f32 %v2520_v11 }
0x10ce   :  { %v4858_v19 = vpop.permute.xlu1 %4857 }
0x10cf   :  { %v4853_v22 = vpop.permute.xlu0 %4852  ;;  %v4860_v13 = vunpack.i.h.bf16 %v4858_v19  ;;  %v4859_v15 = vunpack.i.l.bf16 %v4858_v19 }
0x10d0   :  { %v4855_v16 = vunpack.i.h.bf16 %v4853_v22  ;;  %v4854_v17 = vunpack.i.l.bf16 %v4853_v22 }
0x10d1   :  { %v4756_v23 = vpack.c.bf16 %v4860_v13, %v4859_v15 }
0x10d2   :  { %v4752_v27 = vpack.c.bf16 %v4855_v16, %v4854_v17  ;;  %v2675_v28 = vpop.permute.xlu1 %2674 }
0x10d5   :  { %v4952_v18 = vpop.eup %4951 }
0x10d6   :  { %v4954_v20 = vpop.eup %4953  ;;  %v2527_v21 = vmul.f32 %v4952_v18, %v4948_v0  ;;  %v2757_v29 = vpop.permute.xlu1 %2756  ;;  %v6132_v0 = vpack.i.bf16 %v6065_v39, %v6067_v12 }
0x10d7   :  { %v2526_v25 = vmul.f32 %v4954_v20, %v4950_v2 }
0x10d8   :  { %4554 = vmatmul.mubr.msk.f32.vlgmr.msra.gmra.mrb[30].mxu1 %vm1905_vm4, %v2527_v21 }
0x10d9   :  { %4758 = vmatpush3.bf16.xpose.msk.msra.mxu1 %vm6039_vm5, %v4756_v23  ;;  %4547 = vmatmul.mubr.msk.f32.vlgmr.msra.gmra.mrb[24].mxu0 %vm1905_vm4, %v2526_v25 }
0x10da   :  { %4754 = vmatpush3.bf16.xpose.msk.msra.mxu0 %vm6039_vm5, %v4752_v27  ;;  %4567 = vmatprep.mubr.msk.f32.mxu1 %vm5375_vm1, %v5374_v14 }
0x10db   :  { %4560 = vmatprep.mubr.msk.f32.mxu0 %vm5375_vm1, %v5374_v14  ;;  %4762 = vmatprep.subr.bf16.mxu1 %v5381_v58 }
0x10dc   :  { %4759 = vmatprep.subr.bf16.mxu0 %v5381_v58 }
0x10e0   :  { %4568 = vmatmul.mubr.msk.f32.vlgmr.msra.gmra.mrb[32].mxu1 %vm550_vm2, %v2757_v29 }
0x10e1   :  { %4561 = vmatmul.mubr.msk.f32.vlgmr.msra.gmra.mrb[26].mxu0 %vm550_vm2, %v2675_v28  ;;  %4581 = vmatprep.mubr.msk.f32.mxu1 %vm5375_vm1, %v5374_v14 }
0x10e2   :  { %4574 = vmatprep.mubr.msk.f32.mxu0 %vm5375_vm1, %v5374_v14 }
0x11ab   :  { %v6111_v30 = vpop.f32.mrb[30].mxu1 }
0x11ac   :  { %v6113_v31 = vpop.f32.mrb[24].mxu0  ;;  %v4555_v34 = vpop.f32.mrb[31].mxu1 }
0x11ad   :  { %v4548_v36 = vpop.f32.mrb[25].mxu0 }
0x11b3   :  { %v2834_v38 = vpop.f32.mrb[32].mxu1 }
0x11b4   :  { %v2839_v40 = vmul.f32 0.35355338, %v2834_v38  ;;  %v2752_v5 = vpop.f32.mrb[26].mxu0  ;;  %v4569_v41 = vpop.f32.mrb[33].mxu1 }
0x11b5   :  { %v2838_v42 = vmul.f32 0.35355338, %v2752_v5  ;;  %v4562_v43 = vpop.f32.mrb[27].mxu0 }
0x11b6   :  { %v2841_v32 = vadd.f32 %v2839_v40, %v6075_v37 }
0x11b7   :  { %v2840_v44 = vadd.f32 %v2838_v42, %v6077_v50 }
0x11b8   :  { %v2845_v46 = vsel %vm1905_vm4, %v2841_v32, -inf }
0x11b9   :  { %2846 = vmax.xlane.f32.xlu1 %v2845_v46  ;;  %v2842_v47 = vsel %vm1905_vm4, %v2840_v44, -inf }
0x11ba   :  { %2843 = vmax.xlane.f32.xlu0 %v2842_v47 }
0x11ca   :  { %4867 = vrot.lane.b32.xlu1 %v6072_v45, %s5376_s6 }
0x11ce   :  { %4872 = vrot.lane.b32.xlu1 %v6043_v26, %s5377_s2 }
0x11d2   :  { %4877 = vrot.lane.b32.xlu1 %v6048_v7, %s5377_s2 }
0x11d6   :  { %3108 = vrot.lane.b32.xlu1 %v6053_v33, %s5377_s2 }
0x1246   :  { %v2847_v48 = vpop.xlane.xlu1 %2846 }
0x1247   :  { %v2849_v56 = vsub.f32 %v2841_v32, %v2847_v48  ;;  %v2844_v49 = vpop.xlane.xlu0 %2843 }
0x1248   :  { %v2848_v51 = vsub.f32 %v2840_v44, %v2844_v49 }
0x1249   :  { %v2852_v52 = vmul.f32 1.442695, %v2849_v56 }
0x124a   :  { %v2850_v53 = vmul.f32 1.442695, %v2848_v51  ;;  %v4868_v54 = vpop.permute.xlu1 %4867 }
0x124b   :  { %4955 = vpow2.f32 %v2852_v52  ;;  %v4870_v55 = vunpack.i.h.bf16 %v4868_v54  ;;  %v4869_v59 = vunpack.i.l.bf16 %v4868_v54 }
0x124c   :  { %4957 = vpow2.f32 %v2850_v53 }
0x124d   :  { %v4763_v60 = vpack.c.bf16 %v4870_v55, %v4869_v59 }
0x124e   :  { %v4873_v2 = vpop.permute.xlu1 %4872 }
0x124f   :  { %4764 = vmatpush3.bf16.msra.mxu1 %v4763_v60  ;;  %v4875_v20 = vunpack.i.h.bf16 %v4873_v2  ;;  %v4874_v21 = vunpack.i.l.bf16 %v4873_v2 }
0x1250   :  { %4769 = vmatprep.subr.bf16.mxu1 %v5381_v58 }
0x1251   :  { %v4766_v23 = vpack.c.bf16 %v4875_v20, %v4874_v21 }
0x1252   :  { %v4878_v9 = vpop.permute.xlu1 %4877 }
0x1253   :  { %v4880_v19 = vunpack.i.h.bf16 %v4878_v9  ;;  %v4879_v22 = vunpack.i.l.bf16 %v4878_v9 }
0x1255   :  { %v4956_v57 = vpop.eup %4955  ;;  %v4770_v17 = vpack.c.bf16 %v4880_v19, %v4879_v22 }
0x1256   :  { %v2857_v61 = vsel %vm1905_vm4, %v4956_v57, 0.0  ;;  %v4958_v62 = vpop.eup %4957  ;;  %v3109_v27 = vpop.permute.xlu1 %3108 }
0x1257   :  { %2858 = vadd.xlane.f32.xlu0 %v2857_v61  ;;  %v2854_v63 = vsel %vm1905_vm4, %v4958_v62, 0.0 }
0x125b   :  { %2855 = vadd.xlane.f32.xlu0 %v2854_v63 }
0x1271   :  { %4862 = vrot.lane.b32.xlu0 %v6132_v0, %s5376_s6 }
0x1275   :  { %3026 = vrot.lane.b32.xlu0 %v6055_v35, %s5377_s2 }
0x12e4   :  { %v2859_v6 = vpop.xlane.xlu0 %2858 }
0x12e5   :  { %4959 = vrcp.f32 %v2859_v6 }
0x12e8   :  { %v2856_v8 = vpop.xlane.xlu0 %2855 }
0x12e9   :  { %4961 = vrcp.f32 %v2856_v8 }
0x12ec   :  { %v4863_v11 = vpop.permute.xlu0 %4862 }
0x12ed   :  { %v4865_v13 = vunpack.i.h.bf16 %v4863_v11  ;;  %v4864_v15 = vunpack.i.l.bf16 %v4863_v11 }
0x12ef   :  { %v4960_v16 = vpop.eup %4959  ;;  %v4760_v39 = vpack.c.bf16 %v4865_v13, %v4864_v15 }
0x12f0   :  { %v2863_v12 = vmul.f32 %v4960_v16, %v4956_v57  ;;  %v3027_v28 = vpop.permute.xlu0 %3026 }
0x12f1   :  { %4761 = vmatpush3.bf16.msra.mxu0 %v4760_v39 }
0x12f2   :  { %4582 = vmatmul.mubr.msk.f32.vlgmr.msra.gmra.mrb[34].mxu1 %vm1905_vm4, %v2863_v12  ;;  %4765 = vmatprep.subr.bf16.mxu0 %v5381_v58 }
0x12f3   :  { %v4962_v18 = vpop.eup %4961  ;;  %4772 = vmatpush3.bf16.xpose.msk.msra.mxu1 %vm6039_vm5, %v4770_v17  ;;  %4595 = vmatprep.mubr.msk.f32.mxu1 %vm5375_vm1, %v5374_v14 }
0x12f4   :  { %v2862_v25 = vmul.f32 %v4962_v18, %v4958_v62  ;;  %4776 = vmatprep.subr.bf16.mxu1 %v5381_v58 }
0x12f6   :  { %4575 = vmatmul.mubr.msk.f32.vlgmr.msra.gmra.mrb[28].mxu0 %vm1905_vm4, %v2862_v25 }
0x12f7   :  { %4588 = vmatprep.mubr.msk.f32.mxu0 %vm5375_vm1, %v5374_v14 }
0x12fa   :  { %4596 = vmatmul.mubr.msk.f32.vlgmr.msra.gmra.mrb[36].mxu1 %vm550_vm2, %v3109_v27  ;;  %4768 = vmatpush3.bf16.xpose.msk.msra.mxu0 %vm6039_vm5, %v4766_v23 }
0x12fb   :  { %4609 = vmatprep.mubr.msk.f32.mxu1 %vm5375_vm1, %v5374_v14  ;;  %4773 = vmatprep.subr.bf16.mxu0 %v5381_v58 }
0x1301   :  { %4589 = vmatmul.mubr.msk.f32.vlgmr.msra.gmra.mrb[30].mxu0 %vm550_vm2, %v3027_v28 }
0x1302   :  { %4602 = vmatprep.mubr.msk.f32.mxu0 %vm5375_vm1, %v5374_v14 }
0x13c5   :  { %v6157_v29 = vpop.f32.mrb[34].mxu1 }
0x13c6   :  { %v4583_v34 = vpop.f32.mrb[35].mxu1 }
0x13c9   :  { %v6159_v36 = vpop.f32.mrb[28].mxu0 }
0x13ca   :  { %v4576_v38 = vpop.f32.mrb[29].mxu0 }
0x13cd   :  { %v3186_v40 = vpop.f32.mrb[36].mxu1 }
0x13ce   :  { %v3191_v5 = vmul.f32 0.35355338, %v3186_v40  ;;  %v4597_v41 = vpop.f32.mrb[37].mxu1 }
0x13d0   :  { %v3193_v42 = vadd.f32 %v3191_v5, %v6075_v37 }
0x13d2   :  { %v3197_v43 = vsel %vm1905_vm4, %v3193_v42, -inf }
0x13d3   :  { %3198 = vmax.xlane.f32.xlu1 %v3197_v43 }
0x13d4   :  { %v3104_v32 = vpop.f32.mrb[30].mxu0 }
0x13d5   :  { %v3190_v44 = vmul.f32 0.35355338, %v3104_v32  ;;  %v4590_v46 = vpop.f32.mrb[31].mxu0 }
0x13d7   :  { %v3192_v47 = vadd.f32 %v3190_v44, %v6077_v50 }
0x13d9   :  { %v3194_v48 = vsel %vm1905_vm4, %v3192_v47, -inf }
0x13da   :  { %3195 = vmax.xlane.f32.xlu0 %v3194_v48 }
0x13e4   :  { %4887 = vrot.lane.b32.xlu1 %v6072_v45, %s5377_s2 }
0x13e8   :  { %4892 = vrot.lane.b32.xlu1 %v6043_v26, %s5378_s16 }
0x13ec   :  { %4897 = vrot.lane.b32.xlu1 %v6048_v7, %s5378_s16 }
0x13f0   :  { %3456 = vrot.lane.b32.xlu1 %v6053_v33, %s5378_s16 }
0x1460   :  { %v3199_v56 = vpop.xlane.xlu1 %3198 }
0x1461   :  { %v3201_v49 = vsub.f32 %v3193_v42, %v3199_v56 }
0x1463   :  { %v3204_v51 = vmul.f32 1.442695, %v3201_v49 }
0x1464   :  { %v4888_v52 = vpop.permute.xlu1 %4887 }
0x1465   :  { %4963 = vpow2.f32 %v3204_v51  ;;  %v4890_v53 = vunpack.i.h.bf16 %v4888_v52  ;;  %v4889_v54 = vunpack.i.l.bf16 %v4888_v52 }
0x1467   :  { %v4777_v55 = vpack.c.bf16 %v4890_v53, %v4889_v54  ;;  %v3196_v59 = vpop.xlane.xlu0 %3195 }
0x1468   :  { %v3200_v60 = vsub.f32 %v3192_v47, %v3196_v59  ;;  %v4893_v62 = vpop.permute.xlu1 %4892 }
0x1469   :  { %4778 = vmatpush3.bf16.msra.mxu1 %v4777_v55  ;;  %v4895_v12 = vunpack.i.h.bf16 %v4893_v62  ;;  %v4894_v17 = vunpack.i.l.bf16 %v4893_v62 }
0x146a   :  { %v3202_v57 = vmul.f32 1.442695, %v3200_v60  ;;  %4783 = vmatprep.subr.bf16.mxu1 %v5381_v58 }
0x146b   :  { %v4780_v21 = vpack.c.bf16 %v4895_v12, %v4894_v17 }
0x146c   :  { %4965 = vpow2.f32 %v3202_v57  ;;  %v4898_v2 = vpop.permute.xlu1 %4897 }
0x146d   :  { %v4900_v8 = vunpack.i.h.bf16 %v4898_v2  ;;  %v4899_v9 = vunpack.i.l.bf16 %v4898_v2  ;;  %v3754_v2 = vld [vmem:[%s6329_s18 + $0x10] sm:$0xff] }
0x146f   :  { %v4964_v26 = vpop.eup %4963  ;;  %v4784_v16 = vpack.c.bf16 %v4900_v8, %v4899_v9  ;;  %v3755_v8 = vld [vmem:[%s6329_s18 + $0x18] sm:$0xff] }
0x1470   :  { %v3209_v7 = vsel %vm1905_vm4, %v4964_v26, 0.0  ;;  %v3457_v20 = vpop.permute.xlu1 %3456  ;;  %v4797_v9 = vpack.c.bf16 %v3755_v8, %v3754_v2 }
0x1471   :  { %3210 = vadd.xlane.f32.xlu0 %v3209_v7 }
0x1476   :  { %v4966_v33 = vpop.eup %4965 }
0x1477   :  { %v3206_v61 = vsel %vm1905_vm4, %v4966_v33, 0.0 }
0x1478   :  { %3207 = vadd.xlane.f32.xlu0 %v3206_v61 }
0x148e   :  { %4882 = vrot.lane.b32.xlu0 %v6132_v0, %s5377_s2 }
0x1492   :  { %3374 = vrot.lane.b32.xlu0 %v6055_v35, %s5378_s16 }
0x14fe   :  { %v3211_v63 = vpop.xlane.xlu0 %3210 }
0x14ff   :  { %4967 = vrcp.f32 %v3211_v63  ;;  %v3753_v63 = vld [vmem:[%s6329_s18 + $0x8] sm:$0xff] }
0x1505   :  { %v3208_v6 = vpop.xlane.xlu0 %3207 }
0x1506   :  { %4969 = vrcp.f32 %v3208_v6 }
0x1509   :  { %v4968_v11 = vpop.eup %4967  ;;  %v4883_v19 = vpop.permute.xlu0 %4882 }
0x150a   :  { %v3215_v22 = vmul.f32 %v4968_v11, %v4964_v26  ;;  %v4885_v13 = vunpack.i.h.bf16 %v4883_v19  ;;  %v4884_v15 = vunpack.i.l.bf16 %v4883_v19 }
0x150c   :  { %v4774_v39 = vpack.c.bf16 %v4885_v13, %v4884_v15  ;;  %4610 = vmatmul.mubr.msk.f32.vlgmr.msra.gmra.mrb[38].mxu1 %vm1905_vm4, %v3215_v22 }
0x150d   :  { %4786 = vmatpush3.bf16.xpose.msk.msra.mxu1 %vm6039_vm5, %v4784_v16  ;;  %4623 = vmatprep.mubr.msk.f32.mxu1 %vm5375_vm1, %v5374_v14  ;;  %v3375_v25 = vpop.permute.xlu0 %3374 }
0x150e   :  { %4775 = vmatpush3.bf16.msra.mxu0 %v4774_v39  ;;  %4790 = vmatprep.subr.bf16.mxu1 %v5381_v58 }
0x150f   :  { %4779 = vmatprep.subr.bf16.mxu0 %v5381_v58 }
0x1510   :  { %v4970_v35 = vpop.eup %4969 }
0x1511   :  { %v3214_v18 = vmul.f32 %v4970_v35, %v4966_v33 }
0x1513   :  { %4603 = vmatmul.mubr.msk.f32.vlgmr.msra.gmra.mrb[32].mxu0 %vm1905_vm4, %v3214_v18 }
0x1514   :  { %4624 = vmatmul.mubr.msk.f32.vlgmr.msra.gmra.mrb[40].mxu1 %vm550_vm2, %v3457_v20  ;;  %4616 = vmatprep.mubr.msk.f32.mxu0 %vm5375_vm1, %v5374_v14 }
0x1515   :  { %4637 = vmatprep.mubr.msk.f32.mxu1 %vm5375_vm1, %v5374_v14 }
0x1517   :  { %4782 = vmatpush3.bf16.xpose.msk.msra.mxu0 %vm6039_vm5, %v4780_v21 }
0x1518   :  { %4787 = vmatprep.subr.bf16.mxu0 %v5381_v58 }
0x151e   :  { %4617 = vmatmul.mubr.msk.f32.vlgmr.msra.gmra.mrb[34].mxu0 %vm550_vm2, %v3375_v25 }
0x151f   :  { %4630 = vmatprep.mubr.msk.f32.mxu0 %vm5375_vm1, %v5374_v14 }
0x15df   :  { %v3370_v23 = vpop.f32.mrb[38].mxu1 }
0x15e0   :  { %v4611_v27 = vpop.f32.mrb[39].mxu1 }
0x15e6   :  { %v3291_v28 = vpop.f32.mrb[32].mxu0 }
0x15e7   :  { %v3534_v34 = vpop.f32.mrb[40].mxu1  ;;  %v4604_v38 = vpop.f32.mrb[33].mxu0 }
0x15e8   :  { %v3539_v40 = vmul.f32 0.35355338, %v3534_v34  ;;  %v4625_v5 = vpop.f32.mrb[41].mxu1 }
0x15ea   :  { %v3541_v41 = vadd.f32 %v3539_v40, %v6075_v37 }
0x15ec   :  { %v3545_v4 = vsel %vm1905_vm4, %v3541_v41, -inf }
0x15ed   :  { %3546 = vmax.xlane.f32.xlu1 %v3545_v4 }
0x15f1   :  { %v3452_v42 = vpop.f32.mrb[34].mxu0 }
0x15f2   :  { %v3538_v58 = vmul.f32 0.35355338, %v3452_v42  ;;  %v4618_v43 = vpop.f32.mrb[35].mxu0 }
0x15f4   :  { %v3540_v32 = vadd.f32 %v3538_v58, %v6077_v50 }
0x15f6   :  { %v3542_v44 = vsel %vm1905_vm4, %v3540_v32, -inf }
0x15f7   :  { %3543 = vmax.xlane.f32.xlu0 %v3542_v44 }
0x15fe   :  { %4907 = vrot.lane.b32.xlu1 %v6072_v45, %s5378_s16 }
0x1602   :  { %3724 = vrot.lane.b32.xlu1 %v6159_v36, %s6369_s0 }
0x1606   :  { %3726 = vrot.lane.b32.xlu1 %v6157_v29, %s6369_s0 }
0x160a   :  { %3734 = vrot.lane.b32.xlu1 %v3370_v23, %s5379_s9 }
0x167a   :  { %v3547_v14 = vpop.xlane.xlu1 %3546 }
0x167b   :  { %v3549_v37 = vsub.f32 %v3541_v41, %v3547_v14 }
0x167d   :  { %v3552_v46 = vmul.f32 1.442695, %v3549_v37 }
0x167e   :  { %v4908_v47 = vpop.permute.xlu1 %4907 }
0x167f   :  { %4971 = vpow2.f32 %v3552_v46  ;;  %v4910_v50 = vunpack.i.h.bf16 %v4908_v47  ;;  %v4909_v48 = vunpack.i.l.bf16 %v4908_v47 }
0x1681   :  { %v4791_v56 = vpack.c.bf16 %v4910_v50, %v4909_v48  ;;  %v3877_v50 = vld [vmem:[#allocation25 + $0x8] sm:$0xff] }
0x1682   :  { %v3725_v15 = vpop.permute.xlu1 %3724 }
0x1683   :  { %4792 = vmatpush3.bf16.msra.mxu1 %v4791_v56  ;;  %v3746_v12 = vsel %vm550_vm2, %v6113_v31, %v3725_v15  ;;  %v4208_v31 = vld [vmem:[%s6330_s19] ss:$0 sm:$0xff]  ;;  %v3878_v56 = vld [vmem:[#allocation25 + $0x10] sm:$0xff] }
0x1684   :  { %v3544_v49 = vpop.xlane.xlu0 %3543 }
0x1685   :  { %v3548_v51 = vsub.f32 %v3540_v32, %v3544_v49  ;;  %v3879_v49 = vld [vmem:[#allocation25 + $0x18] sm:$0xff] }
0x1686   :  { %v3727_v16 = vpop.permute.xlu1 %3726 }
0x1687   :  { %v3550_v45 = vmul.f32 1.442695, %v3548_v51  ;;  %v3747_v18 = vsel %vm550_vm2, %v6111_v30, %v3727_v16  ;;  %v4805_v51 = vpack.c.bf16 %v3879_v49, %v3878_v56  ;;  %v4211_v16 = vld [vmem:[%s6332_s21] ss:$0 sm:$0xff]  ;;  %s5382_s21 = smov [#allocation26]  }
0x1689   :  { %v4972_v52 = vpop.eup %4971  ;;  %4973 = vpow2.f32 %v3550_v45  ;;  %v3970_v45 = vld [vmem:[%s6333_s22] sm:$0xff] }
0x168a   :  { %v3557_v36 = vsel %vm1905_vm4, %v4972_v52, 0.0  ;;  %v3735_v39 = vpop.permute.xlu1 %3734 }
0x168b   :  { %3558 = vadd.xlane.f32.xlu0 %v3557_v36  ;;  %v3749_v25 = vsel %vm1905_vm4, %v3747_v18, %v3735_v39  ;;  %v3972_v36 = vld [vmem:[%s6333_s22 + $0x10] sm:$0xff] }
0x1693   :  { %v4974_v29 = vpop.eup %4973 }
0x1694   :  { %v3554_v53 = vsel %vm1905_vm4, %v4974_v29, 0.0 }
0x1695   :  { %3555 = vadd.xlane.f32.xlu0 %v3554_v53  ;;  %v3973_v53 = vld [vmem:[%s6333_s22 + $0x18] sm:$0xff] }
0x16ab   :  { %4902 = vrot.lane.b32.xlu0 %v6132_v0, %s5378_s16  ;;  %v3752_v0 = vld [vmem:[%s6329_s18] sm:$0xff] }
0x16ac   :  { %v4793_v6 = vpack.c.bf16 %v3753_v63, %v3752_v0 }
0x16af   :  { %3732 = vrot.lane.b32.xlu0 %v3291_v28, %s5379_s9 }
0x1718   :  { %v3559_v54 = vpop.xlane.xlu0 %3558 }
0x1719   :  { %4975 = vrcp.f32 %v3559_v54  ;;  %v4813_v54 = vpack.c.bf16 %v3973_v53, %v3972_v36 }
0x1722   :  { %v3556_v55 = vpop.xlane.xlu0 %3555 }
0x1723   :  { %v4976_v59 = vpop.eup %4975  ;;  %4977 = vrcp.f32 %v3556_v55  ;;  %v3974_v55 = vld [vmem:[%s6333_s22 + $0x20] sm:$0xff] }
0x1724   :  { %v3563_v60 = vmul.f32 %v4976_v59, %v4972_v52  ;;  %v3971_v52 = vld [vmem:[%s6333_s22 + $0x8] sm:$0xff] }
0x1725   :  { %v3975_v59 = vld [vmem:[%s6333_s22 + $0x28] sm:$0xff] }
0x1726   :  { %4638 = vmatmul.mubr.msk.f32.vlgmr.msra.gmra.mrb[42].mxu1 %vm1905_vm4, %v3563_v60  ;;  %v4903_v57 = vpop.permute.xlu0 %4902  ;;  %v4817_v60 = vpack.c.bf16 %v3975_v59, %v3974_v55 }
0x1727   :  { %v4905_v26 = vunpack.i.h.bf16 %v4903_v57  ;;  %v4904_v7 = vunpack.i.l.bf16 %v4903_v57 }
0x1729   :  { %v4788_v33 = vpack.c.bf16 %v4905_v26, %v4904_v7 }
0x172a   :  { %v3733_v35 = vpop.permute.xlu0 %3732 }
0x172b   :  { %4789 = vmatpush3.bf16.msra.mxu0 %v4788_v33  ;;  %v3748_v20 = vsel %vm1905_vm4, %v3746_v12, %v3733_v35 }
0x172c   :  { %4794 = vmatprep.subr.bf16.mxu0 %v4793_v6 }
0x172d   :  { %v4978_v61 = vpop.eup %4977 }
0x172e   :  { %v3562_v62 = vmul.f32 %v4978_v61, %v4974_v29  ;;  %v4809_v29 = vpack.c.bf16 %v3971_v52, %v3970_v45 }
0x1730   :  { %4631 = vmatmul.mubr.msk.f32.vlgmr.msra.gmra.mrb[36].mxu0 %vm1905_vm4, %v3562_v62 }
0x1731   :  { %4796 = vmatpush3.bf16.msra.mxu0 %v4793_v6 }
0x1732   :  { %4798 = vmatprep.subr.bf16.mxu0 %v4797_v9 }
0x1735   :  { %4800 = vmatpush3.bf16.msra.mxu0 %v4797_v9 }
0x1736   :  { %4810 = vmatprep.subr.bf16.mxu0 %v4809_v29 }
0x17f9   :  { %v3718_v11 = vpop.f32.mrb[42].mxu1 }
0x17fa   :  { %3742 = vrot.lane.b32.xlu1 %v3718_v11, %s5380_s28  ;;  %v4639_v19 = vpop.f32.mrb[43].mxu1 }
0x1803   :  { %v3639_v22 = vpop.f32.mrb[36].mxu0 }
0x1804   :  { %3740 = vrot.lane.b32.xlu0 %v3639_v22, %s5380_s28  ;;  %v4632_v13 = vpop.f32.mrb[37].mxu0  ;;  %v3976_v22 = vld [vmem:[%s6333_s22 + $0x30] sm:$0xff] }
0x1805   :  { %v3977_v13 = vld [vmem:[%s6333_s22 + $0x38] sm:$0xff]  ;;  %s4106_s22 = sshll.u32 %s5382_s21, 4  ;;  %s4107_s22 = int_to_ptr.vmem [resolvable:$true] %s4106_s22 }
0x1806   :  { %v4821_v15 = vpack.c.bf16 %v3977_v13, %v3976_v22  ;;  %p5322_p9 = scmp.lt.s32.totalorder %s4107_s22, %s4107_s22 }
0x186c   :  { %v3743_v17 = vpop.permute.xlu1 %3742 }
0x186d   :  { %v3751_v27 = vsel %vm1908_vm3, %v3749_v25, %v3743_v17 }
0x1876   :  { %v3741_v21 = vpop.permute.xlu0 %3740 }
0x1877   :  { %v3750_v23 = vsel %vm1908_vm3, %v3748_v20, %v3741_v21  ;;  %v4214_v21 = vld [vmem:[%s6334_s23] ss:$0 sm:$0xff]  ;;  %s5317_s23 = scalar_lea.vmem %s4107_s22, 256 }
0x1878   :  { %4648 = vmatprep.mubr.msk.f32.mxu0 %vm296_vm0, %v3750_v23  ;;  %p5318_p8 = scmp.ne.s32.totalorder %s4107_s22, %s5317_s23  ;;  %p5323_p10 = scmp.lt.s32.totalorder %s5317_s23, %s5317_s23 }
0x1879   :  { %4649 = vmatmul.mubr.msk.f32.vlgmr.msra.gmra.mrb[38].mxu0 %vm296_vm0, %v3751_v27 }
0x187a   :  { %4812 = vmatpush3.bf16.msra.mxu0 %v4809_v29  ;;  %p5324_p11 = por %p5323_p10, %p5322_p9 }
0x187b   :  { %4814 = vmatprep.subr.bf16.mxu0 %v4813_v54 }
0x187c   :  { %p5325_p12 = pnand %p5324_p11, %p5318_p8 }
0x187e   :  { %4816 = vmatpush3.bf16.msra.mxu0 %v4813_v54 }
0x187f   :  { %4818 = vmatprep.subr.bf16.mxu0 %v4817_v60 }
0x1882   :  { %4820 = vmatpush3.bf16.msra.mxu0 %v4817_v60 }
0x1883   :  { %4822 = vmatprep.subr.bf16.mxu0 %v4821_v15 }
0x1886   :  { %4824 = vmatpush3.bf16.msra.mxu0 %v4821_v15 }
0x194c   :  { %v4650_v28 = vpop.f32.mrb[38].mxu0 }
0x194d   :  { %v3841_v34 = vadd.f32 %v4650_v28, %v4208_v31  ;;  %v3835_v30 = vpop.f32.mrb[39].mxu0 }
0x194e   :  { %v3836_v38 = vadd.f32 %v4208_v31, %v3835_v30 }
0x194f   :  { %v3845_v40 = vadd.f32 %v3841_v34, %v6026_v24 }
0x1950   :  { %v3844_v5 = vadd.f32 %v3836_v38, %v6020_v10  ;;  %v3876_v10 = vld [vmem:[#allocation25] sm:$0xff] }
0x1951   :  { %v3849_v41 = vsel %vm296_vm0, %v3845_v40, 0.0  ;;  %v4801_v48 = vpack.c.bf16 %v3877_v50, %v3876_v10 }
0x1952   :  { %3850 = vadd.xlane.f32.xlu1 %v3849_v41  ;;  %v3846_v4 = vsel %vm296_vm0, %v3844_v5, 0.0 }
0x1953   :  { %3847 = vadd.xlane.f32.xlu0 %v3846_v4  ;;  %4802 = vmatprep.subr.bf16.mxu1 %v4801_v48 }
0x1954   :  { %4804 = vmatpush3.bf16.msra.mxu1 %v4801_v48 }
0x1955   :  { %4806 = vmatprep.subr.bf16.mxu1 %v4805_v51 }
0x1958   :  { %4808 = vmatpush3.bf16.msra.mxu1 %v4805_v51 }
0x19df   :  { %v3851_v42 = vpop.xlane.xlu1 %3850 }
0x19e0   :  { %v3853_v58 = vmul.f32 0.03125, %v3851_v42  ;;  %v3848_v43 = vpop.xlane.xlu0 %3847 }
0x19e1   :  { %v3852_v32 = vmul.f32 0.03125, %v3848_v43 }
0x19e2   :  { %v3855_v44 = vsub.f32 %v3845_v40, %v3853_v58 }
0x19e3   :  { %v3854_v14 = vsub.f32 %v3844_v5, %v3852_v32 }
0x19e4   :  { %v3857_v47 = vmul.f32 %v3855_v44, %v3855_v44 }
0x19e5   :  { %v3856_v37 = vmul.f32 %v3854_v14, %v3854_v14 }
0x19e6   :  { %v3861_v24 = vsel %vm296_vm0, %v3857_v47, 0.0 }
0x19e7   :  { %v3858_v46 = vsel %vm296_vm0, %v3856_v37, 0.0 }
0x19e8   :  { %3859 = vadd.xlane.f32.xlu0 %v3858_v46 }
0x19ec   :  { %3862 = vadd.xlane.f32.xlu0 %v3861_v24 }
0x1a75   :  { %v3860_v57 = vpop.xlane.xlu0 %3859 }
0x1a76   :  { %v3864_v26 = vmul.f32 0.03125, %v3860_v57 }
0x1a78   :  { %v3866_v7 = vadd.f32 1e-05, %v3864_v26 }
0x1a79   :  { %v3863_v33 = vpop.xlane.xlu0 %3862 }
0x1a7a   :  { %4979 = vrsqrt.f32 %v3866_v7  ;;  %v3865_v61 = vmul.f32 0.03125, %v3863_v33 }
0x1a7c   :  { %v3867_v62 = vadd.f32 1e-05, %v3865_v61 }
0x1a7e   :  { %4981 = vrsqrt.f32 %v3867_v62 }
0x1a84   :  { %v4980_v0 = vpop.eup %4979 }
0x1a85   :  { %v3870_v63 = vmul.f32 %v4980_v0, %v3854_v14 }
0x1a87   :  { %v3872_v2 = vmul.f32 %v6011_v1, %v3870_v63 }
0x1a88   :  { %v4982_v6 = vpop.eup %4981 }
0x1a89   :  { %v3871_v8 = vmul.f32 %v4982_v6, %v3855_v44  ;;  %v3874_v9 = vadd.f32 %v6016_v3, %v3872_v2 }
0x1a8b   :  { %4659 = vmatprep.mubr.msk.f32.mxu1 %vm296_vm0, %v3874_v9  ;;  %v3873_v11 = vmul.f32 %v6011_v1, %v3871_v8 }
0x1a8d   :  { %v3875_v19 = vadd.f32 %v6016_v3, %v3873_v11 }
0x1a8f   :  { %4660 = vmatmul.mubr.msk.f32.vlgmr.msra.gmra.mrb[44].mxu1 %vm296_vm0, %v3875_v19 }
0x1b62   :  { %v4661_v39 = vpop.f32.mrb[44].mxu1 }
0x1b63   :  { %v3965_v35 = vadd.f32 %v4661_v39, %v4211_v16  ;;  %v3959_v12 = vpop.f32.mrb[45].mxu1 }
0x1b64   :  { %v3960_v17 = vadd.f32 %v4211_v16, %v3959_v12 }
0x1b65   :  { %v3969_v20 = vmax.f32 %v3965_v35, 0.0 }
0x1b66   :  { %v3968_v18 = vmax.f32 %v3960_v17, 0.0 }
0x1b68   :  { %4678 = vmatprep.mubr.msk.f32.mxu0 %vm3985_vm6, %v3968_v18 }
0x1b69   :  { %4679 = vmatmul.mubr.msk.f32.vlgmr.msra.gmra.mrb[40].mxu0 %vm3985_vm6, %v3969_v20 }
0x1c3c   :  { %v4680_v25 = vpop.f32.mrb[40].mxu0 }
0x1c3d   :  { %v4064_v23 = vadd.f32 %v4680_v25, %v4214_v21  ;;  %v4058_v27 = vpop.f32.mrb[41].mxu0 }
0x1c3e   :  { %v4059_v31 = vadd.f32 %v4214_v21, %v4058_v27 }
0x1c3f   :  { %v4068_v28 = vadd.f32 %v4064_v23, %v3875_v19 }
0x1c40   :  { %v4067_v34 = vadd.f32 %v4059_v31, %v3874_v9 }
0x1c41   :  { %v4072_v30 = vsel %vm296_vm0, %v4068_v28, 0.0 }
0x1c42   :  { %4073 = vadd.xlane.f32.xlu1 %v4072_v30  ;;  %v4069_v38 = vsel %vm296_vm0, %v4067_v34, 0.0 }
0x1c43   :  { %4070 = vadd.xlane.f32.xlu0 %v4069_v38 }
0x1ccf   :  { %v4074_v40 = vpop.xlane.xlu1 %4073 }
0x1cd0   :  { %v4076_v5 = vmul.f32 0.03125, %v4074_v40  ;;  %v4071_v41 = vpop.xlane.xlu0 %4070 }
0x1cd1   :  { %v4075_v4 = vmul.f32 0.03125, %v4071_v41 }
0x1cd2   :  { %v4078_v42 = vsub.f32 %v4068_v28, %v4076_v5 }
0x1cd3   :  { %v4077_v58 = vsub.f32 %v4067_v34, %v4075_v4 }
0x1cd4   :  { %v4080_v43 = vmul.f32 %v4078_v42, %v4078_v42 }
0x1cd5   :  { %v4079_v32 = vmul.f32 %v4077_v58, %v4077_v58 }
0x1cd6   :  { %v4084_v44 = vsel %vm296_vm0, %v4080_v43, 0.0 }
0x1cd7   :  { %4085 = vadd.xlane.f32.xlu1 %v4084_v44  ;;  %v4081_v14 = vsel %vm296_vm0, %v4079_v32, 0.0 }
0x1cd8   :  { %4082 = vadd.xlane.f32.xlu0 %v4081_v14 }
0x1d64   :  { %v4086_v37 = vpop.xlane.xlu1 %4085 }
0x1d65   :  { %v4088_v46 = vmul.f32 0.03125, %v4086_v37  ;;  %v4083_v47 = vpop.xlane.xlu0 %4082 }
0x1d66   :  { %v4087_v24 = vmul.f32 0.03125, %v4083_v47 }
0x1d67   :  { %v4090_v10 = vadd.f32 1e-05, %v4088_v46 }
0x1d68   :  { %v4089_v50 = vadd.f32 1e-05, %v4087_v24 }
0x1d69   :  { %4983 = vrsqrt.f32 %v4090_v10 }
0x1d6a   :  { %4985 = vrsqrt.f32 %v4089_v50 }
0x1d73   :  { %v4984_v48 = vpop.eup %4983 }
0x1d74   :  { %v4986_v56 = vpop.eup %4985  ;;  %v4094_v49 = vmul.f32 %v4984_v48, %v4078_v42 }
0x1d75   :  { %v4093_v51 = vmul.f32 %v4986_v56, %v4077_v58 }
0x1d76   :  { %v4096_v45 = vmul.f32 %v6011_v1, %v4094_v49 }
0x1d77   :  { %v4095_v52 = vmul.f32 %v6011_v1, %v4093_v51 }
0x1d78   :  { %v4098_v36 = vadd.f32 %v6016_v3, %v4096_v45 }
0x1d79   :  { %v4097_v29 = vadd.f32 %v6016_v3, %v4095_v52 }
0x1d7a   :  { %4100 = vst.msk [vmem:[#allocation26 + $0x8] sm:$0xff] %vm296_vm0, %v4098_v36 }
0x1d7b   :  { %4099 = vst.msk [vmem:[#allocation26] sm:$0xff] %vm296_vm0, %v4097_v29 }
0x1d7c   :  { %5328 = shalt.err (!%p5325_p12)
}
0x1d7d   :  { %s6381_s3 = sld [smem:[#allocation47_spill]] }
0x1d83   :  { %s5329_s8 = scalar_lea.hbm %s6381_s3, 256 }
0x1d84   :  { %p5330_p13 = scmp.ne.s32.totalorder %s6381_s3, %s5329_s8  ;;  %p5333_p0 = scmp.lt.u32.totalorder %s5329_s8, %s6381_s3 }
0x1d86   :  { %p5335_p1 = pnand %p5333_p0, %p5330_p13 }
0x1d88   :  { %5338 = shalt.err (!%p5335_p1)
}
0x1d89   :  { %4112 = dma.vmem_to_hbm [thread:$0]  %s4107_s22, 256, %s6381_s3, [#allocation4], %s6370_s29, %s6370_s29, %s6369_s0  }
0x1d8a   :  { %5355 = dma.done.wait [#allocation4], 256  }
0x1d8b   :  { %5356 = vsyncadd [#allocation4], 4294967040 }
0x1d8c   :  { %4116 = vsyncpa [#allocation3], 1 }
0x1d8d   :  { %4117 = vsyncpa [#allocation6], 1 }
0x1d8e   :  { %4118 = vsyncpa [#allocation9], 1 }
0x1d8f   :  { %4119 = vsyncpa [#allocation12], 1 }
0x1d90   :  { %4120 = vsyncpa [#allocation15], 1 }
0x1d91   :  { %4121 = vsyncpa [#allocation18], 1 }
0x1d92   :  { %4122 = vsyncpa [#allocation21], 1 }
0x1d93   :  { %4123 = vsyncpa [#allocation24], 1 }
0x1d94   :  { %4124 = vsyncpa [#allocation4], 1 }

</bundles_post_ra>
